<compile_context>
chip_gen: v7x
topology: tpu7x:2x2x1
jax: 0.10.0
libtpu: 0.0.40
codegen_flags: <defaults>
</compile_context>

<pallas_src>
import functools

import jax
import jax.numpy as jnp
from jax.experimental import pallas as pl
from jax.experimental.pallas import tpu as pltpu


# ----------------------------------------------------------------------------
# Fused kernel: 4 dilated branch convs + gate conv + fuse conv + layer-norm /
# sigmoid gating + AOT blend + inpainting mask blend, per batch element.
# ----------------------------------------------------------------------------
def _fused_kernel(xg_ref, msk_ref, wbg_ref, bbg_ref, wf_ref, bf_ref,
                  out_ref, xall_ref, mp_ref, *, H, W, R, rates, C):
    WP = W + 2 * R          # wide row length (spatial-on-lanes)
    NW = H * WP             # wide spatial size
    n_valid = H * W

    xg = xg_ref[0]          # (C, Lx)  reflect-padded x, flattened + guards

    # ---- stage all dilated-conv taps (4 branch rates; rate==rates[0] is also
    #      the gate conv's tap set).  Each tap is one contiguous lane slice. --
    # Tap (r, ki, kj) for output flat p = h*WP + c reads padded-x row
    # h + R + (ki-1)*r, col c + (kj-1)*r  ->  flat start offset:
    t = 0
    for r in rates:
        for ki in range(3):
            for kj in range(3):
                s = R + ((R - r) + ki * r) * WP + (kj - 1) * r
                xall_ref[t * C:(t + 1) * C, :] = xg[:, s:s + NW]
                t += 1

    # ---- one fat MXU contraction: 4 branches (block-diag) + gate -----------
    mg = jnp.dot(wbg_ref[...], xall_ref[...],
                 preferred_element_type=jnp.float32) + bbg_ref[...]
    mid = jnp.maximum(mg[:C, :], 0.0)       # ReLU'd concat of branches (C, NW)
    gate = mg[C:2 * C, :]                   # gate conv output          (C, NW)

    # ---- reflect-pad `mid` by 1 into the wide-flat scratch ------------------
    lane = jax.lax.broadcasted_iota(jnp.int32, (C, NW), 1)
    if (WP & (WP - 1)) == 0:
        col = jnp.bitwise_and(lane, WP - 1)
    else:
        col = lane % WP
    left = pltpu.roll(mid, NW - 2, axis=1)      # left[p]  = mid[p + 2]
    right = pltpu.roll(mid, 2, axis=1)          # right[p] = mid[p - 2]
    midc = jnp.where(col == R - 1, left,        # reflected column w = -1
                     jnp.where(col == R + W, right, mid))  # reflected w = W

    mp_ref[...] = jnp.zeros_like(mp_ref)        # covers the two guard slots
    mp_ref[:, 1 + WP:1 + WP + NW] = midc                               # rows 1..H
    mp_ref[:, 1:1 + WP] = midc[:, WP:2 * WP]                           # top reflect
    mp_ref[:, 1 + (H + 1) * WP:1 + (H + 2) * WP] = \
        midc[:, (H - 2) * WP:(H - 1) * WP]                             # bottom reflect

    # ---- fuse conv (rate 1) taps from padded mid, one K = 9*C matmul -------
    for ki in range(3):
        for kj in range(3):
            tt = ki * 3 + kj
            xall_ref[tt * C:(tt + 1) * C, :] = \
                mp_ref[:, ki * WP + kj:ki * WP + kj + NW]
    fused = jnp.dot(wf_ref[...], xall_ref[:9 * C, :],
                    preferred_element_type=jnp.float32) + bf_ref[...]

    # ---- my_layer_norm(gate) -> sigmoid -> AOT blend -> inpainting blend ---
    xin = xg[:, R + R * WP:R + R * WP + NW]          # original x, wide layout
    valid = jnp.logical_and(col >= R, col < R + W)   # real pixels only
    gv = jnp.where(valid, gate, 0.0)
    mean = jnp.sum(gv, axis=1, keepdims=True) * (1.0 / n_valid)
    d = gate - mean
    dv = jnp.where(valid, d, 0.0)
    var = jnp.sum(dv * dv, axis=1, keepdims=True) * (1.0 / (n_valid - 1))
    std = jnp.sqrt(var) + 1e-9                       # unbiased (torch.std)
    inv_std = pl.reciprocal(std, approx=True)        # EUP, (C, 1)
    t_logit = 10.0 * d * inv_std - 5.0               # 5*(2*(g-mean)/std - 1)
    attn = pl.reciprocal(1.0 + jnp.exp(-t_logit), approx=True)
    aot = xin * (1.0 - attn) + fused * attn          # AOTBlock output

    m = msk_ref[0]                                   # (1, NW) known-region mask
    out_ref[0] = (xin * m + aot * (1.0 - m)).astype(out_ref.dtype)


# ----------------------------------------------------------------------------
# Wrapper: pad/flatten once, run the fused kernel over the batch, un-flatten.
# ----------------------------------------------------------------------------
def bgnet_forward(x_nchw, mask, params, rates):
    B, C, H, W = x_nchw.shape
    R = max(rates)
    assert R < H and R < W, "reflection padding requires max(rate) < spatial size"
    assert len(rates) == 4 and C % 4 == 0
    assert H >= 2 and W >= 2 and H * W > 1
    WP = W + 2 * R
    NW = H * WP
    Lx = (H + 2 * R) * WP + 2 * R
    nt = len(rates) * 9 * C

    # single reflect pad by the max rate, flatten, add R guard zeros per side
    xpad = jnp.pad(x_nchw, ((0, 0), (0, 0), (R, R), (R, R)), mode="reflect")
    xflat = jnp.pad(xpad.reshape(B, C, (H + 2 * R) * WP), ((0, 0), (0, 0), (R, R)))
    # mask in the wide layout (zeros in the garbage columns)
    mask_wide = jnp.pad(mask, ((0, 0), (0, 0), (0, 0), (R, R))).reshape(B, 1, NW)

    kernel = functools.partial(_fused_kernel, H=H, W=W, R=R,
                               rates=tuple(rates), C=C)
    out_wide = pl.pallas_call(
        kernel,
        out_shape=jax.ShapeDtypeStruct((B, C, NW), jnp.float32),
        grid_spec=pltpu.PrefetchScalarGridSpec(
            num_scalar_prefetch=0,
            grid=(B,),
            in_specs=[
                pl.BlockSpec((1, C, Lx), lambda i: (i, 0, 0)),
                pl.BlockSpec((1, 1, NW), lambda i: (i, 0, 0)),
                pl.BlockSpec((2 * C, nt), lambda i: (0, 0)),
                pl.BlockSpec((2 * C, 1), lambda i: (0, 0)),
                pl.BlockSpec((C, 9 * C), lambda i: (0, 0)),
                pl.BlockSpec((C, 1), lambda i: (0, 0)),
            ],
            out_specs=pl.BlockSpec((1, C, NW), lambda i: (i, 0, 0)),
            scratch_shapes=[
                pltpu.VMEM((nt, NW), jnp.float32),               # staged taps
                pltpu.VMEM((C, (H + 2) * WP + 2), jnp.float32),  # padded mid
            ],
        ),
        compiler_params=pltpu.CompilerParams(
            dimension_semantics=("parallel",)),
    )(xflat, mask_wide, params["w_bg"], params["b_bg"],
      params["w_fuse"], params["b_fuse"])

    return out_wide.reshape(B, C, H, WP)[:, :, :, R:R + W]


# ----------------------------------------------------------------------------
# Deterministic synthetic parameters.
# Packed weight layout: column (ki*3 + kj)*Cin + ci.
#  w_bg (2C, 4*9*C): rows [i*C/4,(i+1)*C/4) = branch i (nonzero only in its
#  own 9*C column block); rows [C, 2C) = gate conv (rate-rates[0] column block).
# ----------------------------------------------------------------------------
def init_params(key, C, rates):
    Cq = C // 4
    n = len(rates)
    ks = jax.random.split(key, 2 * n + 4)
    wbg = jnp.zeros((2 * C, n * 9 * C), jnp.float32)
    biases = []
    for i in range(n):
        wb = 0.1 * jax.random.normal(ks[2 * i], (Cq, 9 * C), jnp.float32)
        bb = 0.1 * jax.random.normal(ks[2 * i + 1], (Cq,), jnp.float32)
        wbg = wbg.at[i * Cq:(i + 1) * Cq, i * 9 * C:(i + 1) * 9 * C].set(wb)
        biases.append(bb)
    wg = 0.1 * jax.random.normal(ks[2 * n], (C, 9 * C), jnp.float32)
    bg = 0.1 * jax.random.normal(ks[2 * n + 1], (C,), jnp.float32)
    wbg = wbg.at[C:2 * C, 0:9 * C].set(wg)
    bbg = jnp.concatenate(biases + [bg])[:, None]
    wf = 0.1 * jax.random.normal(ks[2 * n + 2], (C, 9 * C), jnp.float32)
    bf = 0.1 * jax.random.normal(ks[2 * n + 3], (C,), jnp.float32)[:, None]
    return {"w_bg": wbg, "b_bg": bbg, "w_fuse": wf, "b_fuse": bf}


# ----------------------------------------------------------------------------
# Pure-JAX reference (independent of the kernel's layout tricks).
# ----------------------------------------------------------------------------
def reference_forward(x, mask, params, rates):
    B, C, H, W = x.shape
    Cq = C // 4

    def conv(inp, w_pk, b, rate, cout):
        cin = inp.shape[1]
        w = w_pk.reshape(cout, 3, 3, cin).transpose(0, 3, 1, 2)  # OIHW
        xp = jnp.pad(inp, ((0, 0), (0, 0), (rate, rate), (rate, rate)),
                     mode="reflect")
        y = jax.lax.conv_general_dilated(
            xp, w, (1, 1), "VALID", rhs_dilation=(rate, rate),
            dimension_numbers=("NCHW", "OIHW", "NCHW"),
            precision=jax.lax.Precision.HIGHEST)
        return y + b.reshape(1, cout, 1, 1)

    branches = []
    for i, r in enumerate(rates):
        wb = params["w_bg"][i * Cq:(i + 1) * Cq, i * 9 * C:(i + 1) * 9 * C]
        bb = params["b_bg"][i * Cq:(i + 1) * Cq, 0]
        branches.append(jax.nn.relu(conv(x, wb, bb, r, Cq)))
    mid = jnp.concatenate(branches, axis=1)
    fused = conv(mid, params["w_fuse"], params["b_fuse"][:, 0], 1, C)
    gate = conv(x, params["w_bg"][C:2 * C, 0:9 * C],
                params["b_bg"][C:2 * C, 0], rates[0], C)
    n = H * W
    mean = gate.mean(axis=(2, 3), keepdims=True)
    var = jnp.sum((gate - mean) ** 2, axis=(2, 3), keepdims=True) / (n - 1)
    std = jnp.sqrt(var) + 1e-9
    attn = jax.nn.sigmoid(5.0 * (2.0 * (gate - mean) / std - 1.0))
    aot = x * (1.0 - attn) + fused * attn
    return x * mask + aot * (1.0 - mask)


if __name__ == "__main__":
    B, C, H, W = 2, 8, 16, 16
    rates = (1, 2, 4, 8)

    key = jax.random.PRNGKey(0)
    k_x, k_m, k_p = jax.random.split(key, 3)
    x = jax.random.normal(k_x, (B, C, H, W), jnp.float32)
    mask = (jax.random.uniform(k_m, (B, 1, H, W)) > 0.3).astype(jnp.float32)
    params = init_params(k_p, C, rates)

    fwd = jax.jit(functools.partial(bgnet_forward, rates=rates))
    out = fwd(x, mask, params)
    jax.block_until_ready(out)

    assert out.shape == (B, C, H, W)
    assert bool(jnp.all(jnp.isfinite(out)))

    ref = reference_forward(x, mask, params, rates)
    max_err = float(jnp.max(jnp.abs(out - ref)))
    mean_err = float(jnp.mean(jnp.abs(out - ref)))
    assert max_err < 0.2 and mean_err < 0.02, (max_err, mean_err)

    print("KERNEL_OK")
</pallas_src>

<mosaic_0001>
module attributes {stable_mosaic.version = 11 : i64} {
  func.func @_fused_kernel(%arg0: i32, %arg1: memref<1x8x1040xf32, #tpu.memory_space<vmem>>, %arg2: memref<1x1x512xf32, #tpu.memory_space<vmem>>, %arg3: memref<16x288xf32, #tpu.memory_space<vmem>>, %arg4: memref<16x1xf32, #tpu.memory_space<vmem>>, %arg5: memref<8x72xf32, #tpu.memory_space<vmem>>, %arg6: memref<8x1xf32, #tpu.memory_space<vmem>>, %arg7: memref<1x8x512xf32, #tpu.memory_space<vmem>>, %arg8: memref<288x512xf32, #tpu.memory_space<vmem>>, %arg9: memref<8x578xf32, #tpu.memory_space<vmem>>) attributes {dimension_semantics = [#tpu.dimension_semantics<parallel>], iteration_bounds = array<i64: 2>, scalar_prefetch = 0 : i64, scratch_operands = 2 : i64, tpu.core_type = #tpu.core_type<tc>, window_params = [{transform_indices = @transform_0, window_bounds = array<i64: 1, 8, 1040>}, {transform_indices = @transform_1, window_bounds = array<i64: 1, 1, 512>}, {pipeline_mode = #tpu.pipeline_mode<synchronous>, transform_indices = @transform_2, window_bounds = array<i64: 16, 288>}, {pipeline_mode = #tpu.pipeline_mode<synchronous>, transform_indices = @transform_3, window_bounds = array<i64: 16, 1>}, {pipeline_mode = #tpu.pipeline_mode<synchronous>, transform_indices = @transform_4, window_bounds = array<i64: 8, 72>}, {pipeline_mode = #tpu.pipeline_mode<synchronous>, transform_indices = @transform_5, window_bounds = array<i64: 8, 1>}, {transform_indices = @transform_6, window_bounds = array<i64: 1, 8, 512>}]} {
    %c0 = arith.constant 0 : index
    %c0_0 = arith.constant 0 : index
    %c0_1 = arith.constant 0 : index
    %0 = vector.load %arg1[%c0, %c0_0, %c0_1] : memref<1x8x1040xf32, #tpu.memory_space<vmem>>, vector<1x8x1040xf32>
    %1 = vector.shape_cast %0 : vector<1x8x1040xf32> to vector<8x1040xf32>
    %2 = vector.extract_strided_slice %1 {offsets = [0, 231], sizes = [8, 512], strides = [1, 1]} : vector<8x1040xf32> to vector<8x512xf32>
    %c0_2 = arith.constant 0 : index
    %c0_3 = arith.constant 0 : index
    %3 = vector.load %arg8[%c0_2, %c0_3] : memref<288x512xf32, #tpu.memory_space<vmem>>, vector<8x512xf32>
    tpu.vector_store %arg8[%c0_2, %c0_3], %2 {strides = array<i32>} : memref<288x512xf32, #tpu.memory_space<vmem>>, vector<8x512xf32>,
    %4 = vector.extract_strided_slice %1 {offsets = [0, 232], sizes = [8, 512], strides = [1, 1]} : vector<8x1040xf32> to vector<8x512xf32>
    %c8 = arith.constant 8 : index
    %c0_4 = arith.constant 0 : index
    %5 = vector.load %arg8[%c8, %c0_4] : memref<288x512xf32, #tpu.memory_space<vmem>>, vector<8x512xf32>
    tpu.vector_store %arg8[%c8, %c0_4], %4 {strides = array<i32>} : memref<288x512xf32, #tpu.memory_space<vmem>>, vector<8x512xf32>,
    %6 = vector.extract_strided_slice %1 {offsets = [0, 233], sizes = [8, 512], strides = [1, 1]} : vector<8x1040xf32> to vector<8x512xf32>
    %c16 = arith.constant 16 : index
    %c0_5 = arith.constant 0 : index
    %7 = vector.load %arg8[%c16, %c0_5] : memref<288x512xf32, #tpu.memory_space<vmem>>, vector<8x512xf32>
    tpu.vector_store %arg8[%c16, %c0_5], %6 {strides = array<i32>} : memref<288x512xf32, #tpu.memory_space<vmem>>, vector<8x512xf32>,
    %8 = vector.extract_strided_slice %1 {offsets = [0, 263], sizes = [8, 512], strides = [1, 1]} : vector<8x1040xf32> to vector<8x512xf32>
    %c24 = arith.constant 24 : index
    %c0_6 = arith.constant 0 : index
    %9 = vector.load %arg8[%c24, %c0_6] : memref<288x512xf32, #tpu.memory_space<vmem>>, vector<8x512xf32>
    tpu.vector_store %arg8[%c24, %c0_6], %8 {strides = array<i32>} : memref<288x512xf32, #tpu.memory_space<vmem>>, vector<8x512xf32>,
    %10 = vector.extract_strided_slice %1 {offsets = [0, 264], sizes = [8, 512], strides = [1, 1]} : vector<8x1040xf32> to vector<8x512xf32>
    %c32 = arith.constant 32 : index
    %c0_7 = arith.constant 0 : index
    %11 = vector.load %arg8[%c32, %c0_7] : memref<288x512xf32, #tpu.memory_space<vmem>>, vector<8x512xf32>
    tpu.vector_store %arg8[%c32, %c0_7], %10 {strides = array<i32>} : memref<288x512xf32, #tpu.memory_space<vmem>>, vector<8x512xf32>,
    %12 = vector.extract_strided_slice %1 {offsets = [0, 265], sizes = [8, 512], strides = [1, 1]} : vector<8x1040xf32> to vector<8x512xf32>
    %c40 = arith.constant 40 : index
    %c0_8 = arith.constant 0 : index
    %13 = vector.load %arg8[%c40, %c0_8] : memref<288x512xf32, #tpu.memory_space<vmem>>, vector<8x512xf32>
    tpu.vector_store %arg8[%c40, %c0_8], %12 {strides = array<i32>} : memref<288x512xf32, #tpu.memory_space<vmem>>, vector<8x512xf32>,
    %14 = vector.extract_strided_slice %1 {offsets = [0, 295], sizes = [8, 512], strides = [1, 1]} : vector<8x1040xf32> to vector<8x512xf32>
    %c48 = arith.constant 48 : index
    %c0_9 = arith.constant 0 : index
    %15 = vector.load %arg8[%c48, %c0_9] : memref<288x512xf32, #tpu.memory_space<vmem>>, vector<8x512xf32>
    tpu.vector_store %arg8[%c48, %c0_9], %14 {strides = array<i32>} : memref<288x512xf32, #tpu.memory_space<vmem>>, vector<8x512xf32>,
    %16 = vector.extract_strided_slice %1 {offsets = [0, 296], sizes = [8, 512], strides = [1, 1]} : vector<8x1040xf32> to vector<8x512xf32>
    %c56 = arith.constant 56 : index
    %c0_10 = arith.constant 0 : index
    %17 = vector.load %arg8[%c56, %c0_10] : memref<288x512xf32, #tpu.memory_space<vmem>>, vector<8x512xf32>
    tpu.vector_store %arg8[%c56, %c0_10], %16 {strides = array<i32>} : memref<288x512xf32, #tpu.memory_space<vmem>>, vector<8x512xf32>,
    %18 = vector.extract_strided_slice %1 {offsets = [0, 297], sizes = [8, 512], strides = [1, 1]} : vector<8x1040xf32> to vector<8x512xf32>
    %c64 = arith.constant 64 : index
    %c0_11 = arith.constant 0 : index
    %19 = vector.load %arg8[%c64, %c0_11] : memref<288x512xf32, #tpu.memory_space<vmem>>, vector<8x512xf32>
    tpu.vector_store %arg8[%c64, %c0_11], %18 {strides = array<i32>} : memref<288x512xf32, #tpu.memory_space<vmem>>, vector<8x512xf32>,
    %20 = vector.extract_strided_slice %1 {offsets = [0, 198], sizes = [8, 512], strides = [1, 1]} : vector<8x1040xf32> to vector<8x512xf32>
    %c72 = arith.constant 72 : index
    %c0_12 = arith.constant 0 : index
    %21 = vector.load %arg8[%c72, %c0_12] : memref<288x512xf32, #tpu.memory_space<vmem>>, vector<8x512xf32>
    tpu.vector_store %arg8[%c72, %c0_12], %20 {strides = array<i32>} : memref<288x512xf32, #tpu.memory_space<vmem>>, vector<8x512xf32>,
    %22 = vector.extract_strided_slice %1 {offsets = [0, 200], sizes = [8, 512], strides = [1, 1]} : vector<8x1040xf32> to vector<8x512xf32>
    %c80 = arith.constant 80 : index
    %c0_13 = arith.constant 0 : index
    %23 = vector.load %arg8[%c80, %c0_13] : memref<288x512xf32, #tpu.memory_space<vmem>>, vector<8x512xf32>
    tpu.vector_store %arg8[%c80, %c0_13], %22 {strides = array<i32>} : memref<288x512xf32, #tpu.memory_space<vmem>>, vector<8x512xf32>,
    %24 = vector.extract_strided_slice %1 {offsets = [0, 202], sizes = [8, 512], strides = [1, 1]} : vector<8x1040xf32> to vector<8x512xf32>
    %c88 = arith.constant 88 : index
    %c0_14 = arith.constant 0 : index
    %25 = vector.load %arg8[%c88, %c0_14] : memref<288x512xf32, #tpu.memory_space<vmem>>, vector<8x512xf32>
    tpu.vector_store %arg8[%c88, %c0_14], %24 {strides = array<i32>} : memref<288x512xf32, #tpu.memory_space<vmem>>, vector<8x512xf32>,
    %26 = vector.extract_strided_slice %1 {offsets = [0, 262], sizes = [8, 512], strides = [1, 1]} : vector<8x1040xf32> to vector<8x512xf32>
    %c96 = arith.constant 96 : index
    %c0_15 = arith.constant 0 : index
    %27 = vector.load %arg8[%c96, %c0_15] : memref<288x512xf32, #tpu.memory_space<vmem>>, vector<8x512xf32>
    tpu.vector_store %arg8[%c96, %c0_15], %26 {strides = array<i32>} : memref<288x512xf32, #tpu.memory_space<vmem>>, vector<8x512xf32>,
    %28 = vector.extract_strided_slice %1 {offsets = [0, 264], sizes = [8, 512], strides = [1, 1]} : vector<8x1040xf32> to vector<8x512xf32>
    %c104 = arith.constant 104 : index
    %c0_16 = arith.constant 0 : index
    %29 = vector.load %arg8[%c104, %c0_16] : memref<288x512xf32, #tpu.memory_space<vmem>>, vector<8x512xf32>
    tpu.vector_store %arg8[%c104, %c0_16], %28 {strides = array<i32>} : memref<288x512xf32, #tpu.memory_space<vmem>>, vector<8x512xf32>,
    %30 = vector.extract_strided_slice %1 {offsets = [0, 266], sizes = [8, 512], strides = [1, 1]} : vector<8x1040xf32> to vector<8x512xf32>
    %c112 = arith.constant 112 : index
    %c0_17 = arith.constant 0 : index
    %31 = vector.load %arg8[%c112, %c0_17] : memref<288x512xf32, #tpu.memory_space<vmem>>, vector<8x512xf32>
    tpu.vector_store %arg8[%c112, %c0_17], %30 {strides = array<i32>} : memref<288x512xf32, #tpu.memory_space<vmem>>, vector<8x512xf32>,
    %32 = vector.extract_strided_slice %1 {offsets = [0, 326], sizes = [8, 512], strides = [1, 1]} : vector<8x1040xf32> to vector<8x512xf32>
    %c120 = arith.constant 120 : index
    %c0_18 = arith.constant 0 : index
    %33 = vector.load %arg8[%c120, %c0_18] : memref<288x512xf32, #tpu.memory_space<vmem>>, vector<8x512xf32>
    tpu.vector_store %arg8[%c120, %c0_18], %32 {strides = array<i32>} : memref<288x512xf32, #tpu.memory_space<vmem>>, vector<8x512xf32>,
    %34 = vector.extract_strided_slice %1 {offsets = [0, 328], sizes = [8, 512], strides = [1, 1]} : vector<8x1040xf32> to vector<8x512xf32>
    %c128 = arith.constant 128 : index
    %c0_19 = arith.constant 0 : index
    %35 = vector.load %arg8[%c128, %c0_19] : memref<288x512xf32, #tpu.memory_space<vmem>>, vector<8x512xf32>
    tpu.vector_store %arg8[%c128, %c0_19], %34 {strides = array<i32>} : memref<288x512xf32, #tpu.memory_space<vmem>>, vector<8x512xf32>,
    %36 = vector.extract_strided_slice %1 {offsets = [0, 330], sizes = [8, 512], strides = [1, 1]} : vector<8x1040xf32> to vector<8x512xf32>
    %c136 = arith.constant 136 : index
    %c0_20 = arith.constant 0 : index
    %37 = vector.load %arg8[%c136, %c0_20] : memref<288x512xf32, #tpu.memory_space<vmem>>, vector<8x512xf32>
    tpu.vector_store %arg8[%c136, %c0_20], %36 {strides = array<i32>} : memref<288x512xf32, #tpu.memory_space<vmem>>, vector<8x512xf32>,
    %38 = vector.extract_strided_slice %1 {offsets = [0, 132], sizes = [8, 512], strides = [1, 1]} : vector<8x1040xf32> to vector<8x512xf32>
    %c144 = arith.constant 144 : index
    %c0_21 = arith.constant 0 : index
    %39 = vector.load %arg8[%c144, %c0_21] : memref<288x512xf32, #tpu.memory_space<vmem>>, vector<8x512xf32>
    tpu.vector_store %arg8[%c144, %c0_21], %38 {strides = array<i32>} : memref<288x512xf32, #tpu.memory_space<vmem>>, vector<8x512xf32>,
    %40 = vector.extract_strided_slice %1 {offsets = [0, 136], sizes = [8, 512], strides = [1, 1]} : vector<8x1040xf32> to vector<8x512xf32>
    %c152 = arith.constant 152 : index
    %c0_22 = arith.constant 0 : index
    %41 = vector.load %arg8[%c152, %c0_22] : memref<288x512xf32, #tpu.memory_space<vmem>>, vector<8x512xf32>
    tpu.vector_store %arg8[%c152, %c0_22], %40 {strides = array<i32>} : memref<288x512xf32, #tpu.memory_space<vmem>>, vector<8x512xf32>,
    %42 = vector.extract_strided_slice %1 {offsets = [0, 140], sizes = [8, 512], strides = [1, 1]} : vector<8x1040xf32> to vector<8x512xf32>
    %c160 = arith.constant 160 : index
    %c0_23 = arith.constant 0 : index
    %43 = vector.load %arg8[%c160, %c0_23] : memref<288x512xf32, #tpu.memory_space<vmem>>, vector<8x512xf32>
    tpu.vector_store %arg8[%c160, %c0_23], %42 {strides = array<i32>} : memref<288x512xf32, #tpu.memory_space<vmem>>, vector<8x512xf32>,
    %44 = vector.extract_strided_slice %1 {offsets = [0, 260], sizes = [8, 512], strides = [1, 1]} : vector<8x1040xf32> to vector<8x512xf32>
    %c168 = arith.constant 168 : index
    %c0_24 = arith.constant 0 : index
    %45 = vector.load %arg8[%c168, %c0_24] : memref<288x512xf32, #tpu.memory_space<vmem>>, vector<8x512xf32>
    tpu.vector_store %arg8[%c168, %c0_24], %44 {strides = array<i32>} : memref<288x512xf32, #tpu.memory_space<vmem>>, vector<8x512xf32>,
    %46 = vector.extract_strided_slice %1 {offsets = [0, 264], sizes = [8, 512], strides = [1, 1]} : vector<8x1040xf32> to vector<8x512xf32>
    %c176 = arith.constant 176 : index
    %c0_25 = arith.constant 0 : index
    %47 = vector.load %arg8[%c176, %c0_25] : memref<288x512xf32, #tpu.memory_space<vmem>>, vector<8x512xf32>
    tpu.vector_store %arg8[%c176, %c0_25], %46 {strides = array<i32>} : memref<288x512xf32, #tpu.memory_space<vmem>>, vector<8x512xf32>,
    %48 = vector.extract_strided_slice %1 {offsets = [0, 268], sizes = [8, 512], strides = [1, 1]} : vector<8x1040xf32> to vector<8x512xf32>
    %c184 = arith.constant 184 : index
    %c0_26 = arith.constant 0 : index
    %49 = vector.load %arg8[%c184, %c0_26] : memref<288x512xf32, #tpu.memory_space<vmem>>, vector<8x512xf32>
    tpu.vector_store %arg8[%c184, %c0_26], %48 {strides = array<i32>} : memref<288x512xf32, #tpu.memory_space<vmem>>, vector<8x512xf32>,
    %50 = vector.extract_strided_slice %1 {offsets = [0, 388], sizes = [8, 512], strides = [1, 1]} : vector<8x1040xf32> to vector<8x512xf32>
    %c192 = arith.constant 192 : index
    %c0_27 = arith.constant 0 : index
    %51 = vector.load %arg8[%c192, %c0_27] : memref<288x512xf32, #tpu.memory_space<vmem>>, vector<8x512xf32>
    tpu.vector_store %arg8[%c192, %c0_27], %50 {strides = array<i32>} : memref<288x512xf32, #tpu.memory_space<vmem>>, vector<8x512xf32>,
    %52 = vector.extract_strided_slice %1 {offsets = [0, 392], sizes = [8, 512], strides = [1, 1]} : vector<8x1040xf32> to vector<8x512xf32>
    %c200 = arith.constant 200 : index
    %c0_28 = arith.constant 0 : index
    %53 = vector.load %arg8[%c200, %c0_28] : memref<288x512xf32, #tpu.memory_space<vmem>>, vector<8x512xf32>
    tpu.vector_store %arg8[%c200, %c0_28], %52 {strides = array<i32>} : memref<288x512xf32, #tpu.memory_space<vmem>>, vector<8x512xf32>,
    %54 = vector.extract_strided_slice %1 {offsets = [0, 396], sizes = [8, 512], strides = [1, 1]} : vector<8x1040xf32> to vector<8x512xf32>
    %c208 = arith.constant 208 : index
    %c0_29 = arith.constant 0 : index
    %55 = vector.load %arg8[%c208, %c0_29] : memref<288x512xf32, #tpu.memory_space<vmem>>, vector<8x512xf32>
    tpu.vector_store %arg8[%c208, %c0_29], %54 {strides = array<i32>} : memref<288x512xf32, #tpu.memory_space<vmem>>, vector<8x512xf32>,
    %56 = vector.extract_strided_slice %1 {offsets = [0, 0], sizes = [8, 512], strides = [1, 1]} : vector<8x1040xf32> to vector<8x512xf32>
    %c216 = arith.constant 216 : index
    %c0_30 = arith.constant 0 : index
    %57 = vector.load %arg8[%c216, %c0_30] : memref<288x512xf32, #tpu.memory_space<vmem>>, vector<8x512xf32>
    tpu.vector_store %arg8[%c216, %c0_30], %56 {strides = array<i32>} : memref<288x512xf32, #tpu.memory_space<vmem>>, vector<8x512xf32>,
    %58 = vector.extract_strided_slice %1 {offsets = [0, 8], sizes = [8, 512], strides = [1, 1]} : vector<8x1040xf32> to vector<8x512xf32>
    %c224 = arith.constant 224 : index
    %c0_31 = arith.constant 0 : index
    %59 = vector.load %arg8[%c224, %c0_31] : memref<288x512xf32, #tpu.memory_space<vmem>>, vector<8x512xf32>
    tpu.vector_store %arg8[%c224, %c0_31], %58 {strides = array<i32>} : memref<288x512xf32, #tpu.memory_space<vmem>>, vector<8x512xf32>,
    %60 = vector.extract_strided_slice %1 {offsets = [0, 16], sizes = [8, 512], strides = [1, 1]} : vector<8x1040xf32> to vector<8x512xf32>
    %c232 = arith.constant 232 : index
    %c0_32 = arith.constant 0 : index
    %61 = vector.load %arg8[%c232, %c0_32] : memref<288x512xf32, #tpu.memory_space<vmem>>, vector<8x512xf32>
    tpu.vector_store %arg8[%c232, %c0_32], %60 {strides = array<i32>} : memref<288x512xf32, #tpu.memory_space<vmem>>, vector<8x512xf32>,
    %62 = vector.extract_strided_slice %1 {offsets = [0, 256], sizes = [8, 512], strides = [1, 1]} : vector<8x1040xf32> to vector<8x512xf32>
    %c240 = arith.constant 240 : index
    %c0_33 = arith.constant 0 : index
    %63 = vector.load %arg8[%c240, %c0_33] : memref<288x512xf32, #tpu.memory_space<vmem>>, vector<8x512xf32>
    tpu.vector_store %arg8[%c240, %c0_33], %62 {strides = array<i32>} : memref<288x512xf32, #tpu.memory_space<vmem>>, vector<8x512xf32>,
    %64 = vector.extract_strided_slice %1 {offsets = [0, 264], sizes = [8, 512], strides = [1, 1]} : vector<8x1040xf32> to vector<8x512xf32>
    %c248 = arith.constant 248 : index
    %c0_34 = arith.constant 0 : index
    %65 = vector.load %arg8[%c248, %c0_34] : memref<288x512xf32, #tpu.memory_space<vmem>>, vector<8x512xf32>
    tpu.vector_store %arg8[%c248, %c0_34], %64 {strides = array<i32>} : memref<288x512xf32, #tpu.memory_space<vmem>>, vector<8x512xf32>,
    %66 = vector.extract_strided_slice %1 {offsets = [0, 272], sizes = [8, 512], strides = [1, 1]} : vector<8x1040xf32> to vector<8x512xf32>
    %c256 = arith.constant 256 : index
    %c0_35 = arith.constant 0 : index
    %67 = vector.load %arg8[%c256, %c0_35] : memref<288x512xf32, #tpu.memory_space<vmem>>, vector<8x512xf32>
    tpu.vector_store %arg8[%c256, %c0_35], %66 {strides = array<i32>} : memref<288x512xf32, #tpu.memory_space<vmem>>, vector<8x512xf32>,
    %68 = vector.extract_strided_slice %1 {offsets = [0, 512], sizes = [8, 512], strides = [1, 1]} : vector<8x1040xf32> to vector<8x512xf32>
    %c264 = arith.constant 264 : index
    %c0_36 = arith.constant 0 : index
    %69 = vector.load %arg8[%c264, %c0_36] : memref<288x512xf32, #tpu.memory_space<vmem>>, vector<8x512xf32>
    tpu.vector_store %arg8[%c264, %c0_36], %68 {strides = array<i32>} : memref<288x512xf32, #tpu.memory_space<vmem>>, vector<8x512xf32>,
    %70 = vector.extract_strided_slice %1 {offsets = [0, 520], sizes = [8, 512], strides = [1, 1]} : vector<8x1040xf32> to vector<8x512xf32>
    %c272 = arith.constant 272 : index
    %c0_37 = arith.constant 0 : index
    %71 = vector.load %arg8[%c272, %c0_37] : memref<288x512xf32, #tpu.memory_space<vmem>>, vector<8x512xf32>
    tpu.vector_store %arg8[%c272, %c0_37], %70 {strides = array<i32>} : memref<288x512xf32, #tpu.memory_space<vmem>>, vector<8x512xf32>,
    %72 = vector.extract_strided_slice %1 {offsets = [0, 528], sizes = [8, 512], strides = [1, 1]} : vector<8x1040xf32> to vector<8x512xf32>
    %c280 = arith.constant 280 : index
    %c0_38 = arith.constant 0 : index
    %73 = vector.load %arg8[%c280, %c0_38] : memref<288x512xf32, #tpu.memory_space<vmem>>, vector<8x512xf32>
    tpu.vector_store %arg8[%c280, %c0_38], %72 {strides = array<i32>} : memref<288x512xf32, #tpu.memory_space<vmem>>, vector<8x512xf32>,
    %c0_39 = arith.constant 0 : index
    %c0_40 = arith.constant 0 : index
    %74 = vector.load %arg3[%c0_39, %c0_40] : memref<16x288xf32, #tpu.memory_space<vmem>>, vector<16x288xf32>
    %c0_41 = arith.constant 0 : index
    %c0_42 = arith.constant 0 : index
    %75 = vector.load %arg8[%c0_41, %c0_42] : memref<288x512xf32, #tpu.memory_space<vmem>>, vector<288x512xf32>
    %cst = arith.constant dense<0.000000e+00> : vector<16x512xf32>
    %76 = tpu.matmul %74, %75, %cst {dimension_numbers = #tpu.dot_dimension_numbers<[1], [0], [0], [1], [0, 0, 1, 1], [], []>} : vector<16x288xf32>, vector<288x512xf32>, vector<16x512xf32> -> vector<16x512xf32>
    %c0_43 = arith.constant 0 : index
    %c0_44 = arith.constant 0 : index
    %77 = vector.load %arg4[%c0_43, %c0_44] : memref<16x1xf32, #tpu.memory_space<vmem>>, vector<16x1xf32>
    %78 = vector.broadcast %77 : vector<16x1xf32> to vector<16x512xf32>
    %79 = arith.addf %76, %78 : vector<16x512xf32>
    %80 = vector.extract_strided_slice %79 {offsets = [0, 0], sizes = [8, 512], strides = [1, 1]} : vector<16x512xf32> to vector<8x512xf32>
    %cst_45 = arith.constant 0.000000e+00 : f32
    %81 = vector.broadcast %cst_45 : f32 to vector<8x512xf32>
    %82 = arith.maximumf %80, %81 : vector<8x512xf32>
    %83 = vector.extract_strided_slice %79 {offsets = [8, 0], sizes = [8, 512], strides = [1, 1]} : vector<16x512xf32> to vector<8x512xf32>
    %84 = tpu.iota {dimensions = array<i32: 1>} : vector<8x512xi32>
    %c31_i32 = arith.constant 31 : i32
    %85 = vector.broadcast %c31_i32 : i32 to vector<8x512xi32>
    %86 = arith.andi %84, %85 : vector<8x512xi32>
    %c510_i32 = arith.constant 510 : i32
    %87 = tpu.dynamic_rotate %82 by %c510_i32 dim 1 : vector<8x512xf32>, i32 -> vector<8x512xf32>
    %c2_i32 = arith.constant 2 : i32
    %88 = tpu.dynamic_rotate %82 by %c2_i32 dim 1 : vector<8x512xf32>, i32 -> vector<8x512xf32>
    %c7_i32 = arith.constant 7 : i32
    %89 = vector.broadcast %c7_i32 : i32 to vector<8x512xi32>
    %90 = arith.cmpi eq, %86, %89 : vector<8x512xi32>
    %c24_i32 = arith.constant 24 : i32
    %91 = vector.broadcast %c24_i32 : i32 to vector<8x512xi32>
    %92 = arith.cmpi eq, %86, %91 : vector<8x512xi32>
    %93 = arith.select %92, %88, %82 : vector<8x512xi1>, vector<8x512xf32>
    %94 = arith.select %90, %87, %93 : vector<8x512xi1>, vector<8x512xf32>
    %cst_46 = arith.constant 0.000000e+00 : f32
    %95 = vector.broadcast %cst_46 : f32 to vector<8x578xf32>
    %c0_47 = arith.constant 0 : index
    %c0_48 = arith.constant 0 : index
    %96 = vector.load %arg9[%c0_47, %c0_48] : memref<8x578xf32, #tpu.memory_space<vmem>>, vector<8x578xf32>
    tpu.vector_store %arg9[%c0_47, %c0_48], %95 {strides = array<i32>} : memref<8x578xf32, #tpu.memory_space<vmem>>, vector<8x578xf32>,
    %c0_49 = arith.constant 0 : index
    %c33 = arith.constant 33 : index
    %97 = vector.load %arg9[%c0_49, %c33] : memref<8x578xf32, #tpu.memory_space<vmem>>, vector<8x512xf32>
    tpu.vector_store %arg9[%c0_49, %c33], %94 {strides = array<i32>} : memref<8x578xf32, #tpu.memory_space<vmem>>, vector<8x512xf32>,
    %98 = vector.extract_strided_slice %94 {offsets = [0, 32], sizes = [8, 32], strides = [1, 1]} : vector<8x512xf32> to vector<8x32xf32>
    %c0_50 = arith.constant 0 : index
    %c1 = arith.constant 1 : index
    %99 = vector.load %arg9[%c0_50, %c1] : memref<8x578xf32, #tpu.memory_space<vmem>>, vector<8x32xf32>
    tpu.vector_store %arg9[%c0_50, %c1], %98 {strides = array<i32>} : memref<8x578xf32, #tpu.memory_space<vmem>>, vector<8x32xf32>,
    %100 = vector.extract_strided_slice %94 {offsets = [0, 448], sizes = [8, 32], strides = [1, 1]} : vector<8x512xf32> to vector<8x32xf32>
    %c0_51 = arith.constant 0 : index
    %c545 = arith.constant 545 : index
    %101 = vector.load %arg9[%c0_51, %c545] : memref<8x578xf32, #tpu.memory_space<vmem>>, vector<8x32xf32>
    tpu.vector_store %arg9[%c0_51, %c545], %100 {strides = array<i32>} : memref<8x578xf32, #tpu.memory_space<vmem>>, vector<8x32xf32>,
    %c0_52 = arith.constant 0 : index
    %c0_53 = arith.constant 0 : index
    %102 = vector.load %arg9[%c0_52, %c0_53] : memref<8x578xf32, #tpu.memory_space<vmem>>, vector<8x512xf32>
    %c0_54 = arith.constant 0 : index
    %c0_55 = arith.constant 0 : index
    %103 = vector.load %arg8[%c0_54, %c0_55] : memref<288x512xf32, #tpu.memory_space<vmem>>, vector<8x512xf32>
    tpu.vector_store %arg8[%c0_54, %c0_55], %102 {strides = array<i32>} : memref<288x512xf32, #tpu.memory_space<vmem>>, vector<8x512xf32>,
    %c0_56 = arith.constant 0 : index
    %c1_57 = arith.constant 1 : index
    %104 = vector.load %arg9[%c0_56, %c1_57] : memref<8x578xf32, #tpu.memory_space<vmem>>, vector<8x512xf32>
    %c8_58 = arith.constant 8 : index
    %c0_59 = arith.constant 0 : index
    %105 = vector.load %arg8[%c8_58, %c0_59] : memref<288x512xf32, #tpu.memory_space<vmem>>, vector<8x512xf32>
    tpu.vector_store %arg8[%c8_58, %c0_59], %104 {strides = array<i32>} : memref<288x512xf32, #tpu.memory_space<vmem>>, vector<8x512xf32>,
    %c0_60 = arith.constant 0 : index
    %c2 = arith.constant 2 : index
    %106 = vector.load %arg9[%c0_60, %c2] : memref<8x578xf32, #tpu.memory_space<vmem>>, vector<8x512xf32>
    %c16_61 = arith.constant 16 : index
    %c0_62 = arith.constant 0 : index
    %107 = vector.load %arg8[%c16_61, %c0_62] : memref<288x512xf32, #tpu.memory_space<vmem>>, vector<8x512xf32>
    tpu.vector_store %arg8[%c16_61, %c0_62], %106 {strides = array<i32>} : memref<288x512xf32, #tpu.memory_space<vmem>>, vector<8x512xf32>,
    %c0_63 = arith.constant 0 : index
    %c32_64 = arith.constant 32 : index
    %108 = vector.load %arg9[%c0_63, %c32_64] : memref<8x578xf32, #tpu.memory_space<vmem>>, vector<8x512xf32>
    %c24_65 = arith.constant 24 : index
    %c0_66 = arith.constant 0 : index
    %109 = vector.load %arg8[%c24_65, %c0_66] : memref<288x512xf32, #tpu.memory_space<vmem>>, vector<8x512xf32>
    tpu.vector_store %arg8[%c24_65, %c0_66], %108 {strides = array<i32>} : memref<288x512xf32, #tpu.memory_space<vmem>>, vector<8x512xf32>,
    %c0_67 = arith.constant 0 : index
    %c33_68 = arith.constant 33 : index
    %110 = vector.load %arg9[%c0_67, %c33_68] : memref<8x578xf32, #tpu.memory_space<vmem>>, vector<8x512xf32>
    %c32_69 = arith.constant 32 : index
    %c0_70 = arith.constant 0 : index
    %111 = vector.load %arg8[%c32_69, %c0_70] : memref<288x512xf32, #tpu.memory_space<vmem>>, vector<8x512xf32>
    tpu.vector_store %arg8[%c32_69, %c0_70], %110 {strides = array<i32>} : memref<288x512xf32, #tpu.memory_space<vmem>>, vector<8x512xf32>,
    %c0_71 = arith.constant 0 : index
    %c34 = arith.constant 34 : index
    %112 = vector.load %arg9[%c0_71, %c34] : memref<8x578xf32, #tpu.memory_space<vmem>>, vector<8x512xf32>
    %c40_72 = arith.constant 40 : index
    %c0_73 = arith.constant 0 : index
    %113 = vector.load %arg8[%c40_72, %c0_73] : memref<288x512xf32, #tpu.memory_space<vmem>>, vector<8x512xf32>
    tpu.vector_store %arg8[%c40_72, %c0_73], %112 {strides = array<i32>} : memref<288x512xf32, #tpu.memory_space<vmem>>, vector<8x512xf32>,
    %c0_74 = arith.constant 0 : index
    %c64_75 = arith.constant 64 : index
    %114 = vector.load %arg9[%c0_74, %c64_75] : memref<8x578xf32, #tpu.memory_space<vmem>>, vector<8x512xf32>
    %c48_76 = arith.constant 48 : index
    %c0_77 = arith.constant 0 : index
    %115 = vector.load %arg8[%c48_76, %c0_77] : memref<288x512xf32, #tpu.memory_space<vmem>>, vector<8x512xf32>
    tpu.vector_store %arg8[%c48_76, %c0_77], %114 {strides = array<i32>} : memref<288x512xf32, #tpu.memory_space<vmem>>, vector<8x512xf32>,
    %c0_78 = arith.constant 0 : index
    %c65 = arith.constant 65 : index
    %116 = vector.load %arg9[%c0_78, %c65] : memref<8x578xf32, #tpu.memory_space<vmem>>, vector<8x512xf32>
    %c56_79 = arith.constant 56 : index
    %c0_80 = arith.constant 0 : index
    %117 = vector.load %arg8[%c56_79, %c0_80] : memref<288x512xf32, #tpu.memory_space<vmem>>, vector<8x512xf32>
    tpu.vector_store %arg8[%c56_79, %c0_80], %116 {strides = array<i32>} : memref<288x512xf32, #tpu.memory_space<vmem>>, vector<8x512xf32>,
    %c0_81 = arith.constant 0 : index
    %c66 = arith.constant 66 : index
    %118 = vector.load %arg9[%c0_81, %c66] : memref<8x578xf32, #tpu.memory_space<vmem>>, vector<8x512xf32>
    %c64_82 = arith.constant 64 : index
    %c0_83 = arith.constant 0 : index
    %119 = vector.load %arg8[%c64_82, %c0_83] : memref<288x512xf32, #tpu.memory_space<vmem>>, vector<8x512xf32>
    tpu.vector_store %arg8[%c64_82, %c0_83], %118 {strides = array<i32>} : memref<288x512xf32, #tpu.memory_space<vmem>>, vector<8x512xf32>,
    %c0_84 = arith.constant 0 : index
    %c0_85 = arith.constant 0 : index
    %120 = vector.load %arg5[%c0_84, %c0_85] : memref<8x72xf32, #tpu.memory_space<vmem>>, vector<8x72xf32>
    %c0_86 = arith.constant 0 : index
    %c0_87 = arith.constant 0 : index
    %121 = vector.load %arg8[%c0_86, %c0_87] : memref<288x512xf32, #tpu.memory_space<vmem>>, vector<72x512xf32>
    %cst_88 = arith.constant dense<0.000000e+00> : vector<8x512xf32>
    %122 = tpu.matmul %120, %121, %cst_88 {dimension_numbers = #tpu.dot_dimension_numbers<[1], [0], [0], [1], [0, 0, 1, 1], [], []>} : vector<8x72xf32>, vector<72x512xf32>, vector<8x512xf32> -> vector<8x512xf32>
    %c0_89 = arith.constant 0 : index
    %c0_90 = arith.constant 0 : index
    %123 = vector.load %arg6[%c0_89, %c0_90] : memref<8x1xf32, #tpu.memory_space<vmem>>, vector<8x1xf32>
    %124 = vector.broadcast %123 : vector<8x1xf32> to vector<8x512xf32>
    %125 = arith.addf %122, %124 : vector<8x512xf32>
    %126 = vector.extract_strided_slice %1 {offsets = [0, 264], sizes = [8, 512], strides = [1, 1]} : vector<8x1040xf32> to vector<8x512xf32>
    %c8_i32 = arith.constant 8 : i32
    %127 = vector.broadcast %c8_i32 : i32 to vector<8x512xi32>
    %128 = arith.cmpi sge, %86, %127 : vector<8x512xi32>
    %c24_i32_91 = arith.constant 24 : i32
    %129 = vector.broadcast %c24_i32_91 : i32 to vector<8x512xi32>
    %130 = arith.cmpi slt, %86, %129 : vector<8x512xi32>
    %131 = arith.andi %128, %130 : vector<8x512xi1>
    %cst_92 = arith.constant 0.000000e+00 : f32
    %132 = vector.broadcast %cst_92 : f32 to vector<8x512xf32>
    %133 = arith.select %131, %83, %132 : vector<8x512xi1>, vector<8x512xf32>
    %cst_93 = arith.constant dense<0.000000e+00> : vector<8xf32>
    %134 = vector.multi_reduction <add>, %133, %cst_93 [1] : vector<8x512xf32> to vector<8xf32>
    %135 = vector.shape_cast %134 : vector<8xf32> to vector<8x1xf32>
    %cst_94 = arith.constant 3.906250e-03 : f32
    %136 = vector.broadcast %cst_94 : f32 to vector<8x1xf32>
    %137 = arith.mulf %135, %136 : vector<8x1xf32>
    %138 = vector.broadcast %137 : vector<8x1xf32> to vector<8x512xf32>
    %139 = arith.subf %83, %138 : vector<8x512xf32>
    %cst_95 = arith.constant 0.000000e+00 : f32
    %140 = vector.broadcast %cst_95 : f32 to vector<8x512xf32>
    %141 = arith.select %131, %139, %140 : vector<8x512xi1>, vector<8x512xf32>
    %142 = arith.mulf %141, %141 : vector<8x512xf32>
    %cst_96 = arith.constant dense<0.000000e+00> : vector<8xf32>
    %143 = vector.multi_reduction <add>, %142, %cst_96 [1] : vector<8x512xf32> to vector<8xf32>
    %144 = vector.shape_cast %143 : vector<8xf32> to vector<8x1xf32>
    %cst_97 = arith.constant 0.00392156886 : f32
    %145 = vector.broadcast %cst_97 : f32 to vector<8x1xf32>
    %146 = arith.mulf %144, %145 : vector<8x1xf32>
    %147 = math.sqrt %146 : vector<8x1xf32>
    %cst_98 = arith.constant 9.99999971E-10 : f32
    %148 = vector.broadcast %cst_98 : f32 to vector<8x1xf32>
    %149 = arith.addf %147, %148 : vector<8x1xf32>
    %150 = tpu.reciprocal %149 {approx = true} : vector<8x1xf32> -> vector<8x1xf32>
    %cst_99 = arith.constant 1.000000e+01 : f32
    %151 = vector.broadcast %cst_99 : f32 to vector<8x512xf32>
    %152 = arith.mulf %151, %139 : vector<8x512xf32>
    %153 = vector.broadcast %150 : vector<8x1xf32> to vector<8x512xf32>
    %154 = arith.mulf %152, %153 : vector<8x512xf32>
    %cst_100 = arith.constant 5.000000e+00 : f32
    %155 = vector.broadcast %cst_100 : f32 to vector<8x512xf32>
    %156 = arith.subf %154, %155 : vector<8x512xf32>
    %cst_101 = arith.constant 0.000000e+00 : f32
    %157 = vector.broadcast %cst_101 : f32 to vector<8x512xf32>
    %158 = arith.subf %157, %156 : vector<8x512xf32>
    %159 = math.exp %158 : vector<8x512xf32>
    %cst_102 = arith.constant 1.000000e+00 : f32
    %160 = vector.broadcast %cst_102 : f32 to vector<8x512xf32>
    %161 = arith.addf %160, %159 : vector<8x512xf32>
    %162 = tpu.reciprocal %161 {approx = true} : vector<8x512xf32> -> vector<8x512xf32>
    %cst_103 = arith.constant 1.000000e+00 : f32
    %163 = vector.broadcast %cst_103 : f32 to vector<8x512xf32>
    %164 = arith.subf %163, %162 : vector<8x512xf32>
    %165 = arith.mulf %126, %164 : vector<8x512xf32>
    %166 = arith.mulf %125, %162 : vector<8x512xf32>
    %167 = arith.addf %165, %166 : vector<8x512xf32>
    %c0_104 = arith.constant 0 : index
    %c0_105 = arith.constant 0 : index
    %c0_106 = arith.constant 0 : index
    %168 = vector.load %arg2[%c0_104, %c0_105, %c0_106] : memref<1x1x512xf32, #tpu.memory_space<vmem>>, vector<1x1x512xf32>
    %169 = vector.shape_cast %168 : vector<1x1x512xf32> to vector<1x512xf32>
    %170 = vector.broadcast %169 : vector<1x512xf32> to vector<8x512xf32>
    %171 = arith.mulf %126, %170 : vector<8x512xf32>
    %cst_107 = arith.constant 1.000000e+00 : f32
    %172 = vector.broadcast %cst_107 : f32 to vector<1x512xf32>
    %173 = arith.subf %172, %169 : vector<1x512xf32>
    %174 = vector.broadcast %173 : vector<1x512xf32> to vector<8x512xf32>
    %175 = arith.mulf %167, %174 : vector<8x512xf32>
    %176 = arith.addf %171, %175 : vector<8x512xf32>
    %c0_108 = arith.constant 0 : index
    %c0_109 = arith.constant 0 : index
    %c0_110 = arith.constant 0 : index
    %177 = vector.load %arg7[%c0_108, %c0_109, %c0_110] : memref<1x8x512xf32, #tpu.memory_space<vmem>>, vector<1x8x512xf32>
    %178 = vector.shape_cast %177 : vector<1x8x512xf32> to vector<8x512xf32>
    %179 = vector.shape_cast %176 : vector<8x512xf32> to vector<1x8x512xf32>
    tpu.vector_store %arg7[%c0_108, %c0_109, %c0_110], %179 {strides = array<i32>} : memref<1x8x512xf32, #tpu.memory_space<vmem>>, vector<1x8x512xf32>,
    return
  }
  func.func @transform_0(%arg0: i32) -> (i32, i32, i32) {
    %c0_i32 = arith.constant 0 : i32
    %c0_i32_0 = arith.constant 0 : i32
    %c0_i32_1 = arith.constant 0 : i32
    return %arg0, %c0_i32, %c0_i32_0 : i32, i32, i32
  }
  func.func @transform_1(%arg0: i32) -> (i32, i32, i32) {
    %c0_i32 = arith.constant 0 : i32
    %c0_i32_0 = arith.constant 0 : i32
    %c0_i32_1 = arith.constant 0 : i32
    return %arg0, %c0_i32, %c0_i32_0 : i32, i32, i32
  }
  func.func @transform_2(%arg0: i32) -> (i32, i32) {
    %c0_i32 = arith.constant 0 : i32
    %c0_i32_0 = arith.constant 0 : i32
    %c0_i32_1 = arith.constant 0 : i32
    return %c0_i32, %c0_i32_0 : i32, i32
  }
  func.func @transform_3(%arg0: i32) -> (i32, i32) {
    %c0_i32 = arith.constant 0 : i32
    %c0_i32_0 = arith.constant 0 : i32
    %c0_i32_1 = arith.constant 0 : i32
    return %c0_i32, %c0_i32_0 : i32, i32
  }
  func.func @transform_4(%arg0: i32) -> (i32, i32) {
    %c0_i32 = arith.constant 0 : i32
    %c0_i32_0 = arith.constant 0 : i32
    %c0_i32_1 = arith.constant 0 : i32
    return %c0_i32, %c0_i32_0 : i32, i32
  }
  func.func @transform_5(%arg0: i32) -> (i32, i32) {
    %c0_i32 = arith.constant 0 : i32
    %c0_i32_0 = arith.constant 0 : i32
    %c0_i32_1 = arith.constant 0 : i32
    return %c0_i32, %c0_i32_0 : i32, i32
  }
  func.func @transform_6(%arg0: i32) -> (i32, i32, i32) {
    %c0_i32 = arith.constant 0 : i32
    %c0_i32_0 = arith.constant 0 : i32
    %c0_i32_1 = arith.constant 0 : i32
    return %arg0, %c0_i32, %c0_i32_0 : i32, i32, i32
  }
}

</mosaic_0001>

<bundles_post_ra>
// kernel: bgnet_forward.1
= control target key start
LH: loop header
LB: loop body
LE: loop exit
PB: predicated region body
PF: predicated region fallthrough
CT: control target
= control target key end

     0   :  { %s2797_s21 = smov 0   ;;  %s3345_s0 = inlined_call_operand.vmem [shape: f32[2,8,1040], index: 0, kind: input, shape index: {}]   ;;  %s3346_s1 = inlined_call_operand.vmem [shape: f32[2,1,512], index: 1, kind: input, shape index: {}]   ;;  %s3347_s2 = inlined_call_operand.vmem [shape: f32[16,288], index: 2, kind: input, shape index: {}]   ;;  %s3348_s3 = inlined_call_operand.vmem [shape: f32[16,1], index: 3, kind: input, shape index: {}]   ;;  %s3349_s4 = inlined_call_operand.vmem [shape: f32[8,72], index: 4, kind: input, shape index: {}]   ;;  %s3350_s5 = inlined_call_operand.vmem [shape: f32[8,1], index: 5, kind: input, shape index: {}]   ;;  %s3351_s6 = inlined_call_operand.vmem [shape: f32[2,8,512], index: 6, kind: output, shape index: {}]  }
   0x1 LB: > { %s2167_s22 = sadd.s32 4294967295, %s2729_s21   ;;  %p2171_p0 = scmp.ge.s32.totalorder %s2729_s21, 1  ;;  %s2729_s21 = sphi %s2797_s21, %s16_s21  }
   0x2   : > { %p221_p1 = scmp.lt.s32.totalorder %s2729_s21, 3 }
   0x4   : > { %p222_p2 = pnand %p2171_p0, %p221_p1 }
   0x5   : > { %p255_p3 = scmp.lt.s32.totalorder (!%p222_p2), %s2167_s22, 1  ;;  %s2731_s27 = smov (!%p222_p2), 24   ;;  %v815_v14 = vld [vmem:[%s3347_s2 + $0x8] sm:$0xff] (!%p222_p2)  ;;  %vm293_vm0 = vcmask (!%p222_p2), 203776   ;;  %vm316_vm1 = vcmask (!%p222_p2), 195584   ;;  %v2748_v25 = vmov (!%p222_p2), 0.0  }
   0x6   : > { %225 = sbr.rel (%p222_p2) target bundleno = 1438 (0x59e), region = 44  ;;  %s2732_s28 = smov (!%p222_p2), 25   ;;  %1201 = vmatprep.mubr.f32.mxu1 (!%p222_p2), %v815_v14  ;;  %1047 = vmatprep.mubr.f32.mxu0 (!%p222_p2), %v815_v14  ;;  %1346 = vst [vmem:[#allocation3] sm:$0xff] (!%p222_p2), %v2748_v25  ;;  %v964_v43 = vld [vmem:[%s3348_s3] sm:$0xff] (!%p222_p2)  ;;  %v2749_v45 = vmov (!%p222_p2), 0   ;;  %vm339_vm2 = vcmask (!%p222_p2), 187392  }
   0x7   : > { %s2733_s29 = smov (!%p222_p2), 23   ;;  %s2734_s30 = smov (!%p222_p2), 121   ;;  %2626 = vset.pattern.permute.xlu1 (!%p222_p2), %v2749_v45  ;;  %2627 = vset.pattern.permute.xlu0 (!%p222_p2), %v2749_v45  ;;  %vm363_vm3 = vcmask (!%p222_p2), 990208   ;;  %vm386_vm4 = vcmask (!%p222_p2), 982016   ;;  %vm409_vm5 = vcmask (!%p222_p2), 973824   ;;  %vm432_vm6 = vcmask (!%p222_p2), 728064  }
   0x8   : > { %s2735_s7 = smov (!%p222_p2), 120   ;;  %s2736_s8 = smov (!%p222_p2), 119   ;;  %vm455_vm7 = vcmask (!%p222_p2), 719872   ;;  %vm478_vm8 = vcmask (!%p222_p2), 711680   ;;  %vm501_vm9 = vcmask (!%p222_p2), 474112   ;;  %vm524_vm10 = vcmask (!%p222_p2), 457728  }
   0x9   : > { %s2737_s9 = smov (!%p222_p2), 89   ;;  %s2738_s10 = smov (!%p222_p2), 88   ;;  %vm547_vm11 = vcmask (!%p222_p2), 441344   ;;  %vm570_vm12 = vcmask (!%p222_p2), 998400   ;;  %vm597_vm13 = vcmask (!%p222_p2), 965632   ;;  %vm644_vm14 = vcmask (!%p222_p2), 1014784  }
   0xa   : > { %s2739_s11 = smov (!%p222_p2), 87   ;;  %s2740_s12 = smov (!%p222_p2), 58   ;;  %vm675_vm15 = vcmask (!%p222_p2), 949248  }
   0xb   : > { %s2741_s13 = smov (!%p222_p2), 56   ;;  %s2742_s14 = smov (!%p222_p2), 54  }
   0xc   : > { %s2743_s15 = smov (!%p222_p2), 122   ;;  %s2744_s16 = smov (!%p222_p2), 118  }
   0xd   : > { %s3361_s22 = smov (!%p255_p3, %s2167_s22), 1  ;;  %s2745_s17 = smov 124  }
   0xe   : > { %s2381_s23 = smul.u32 72, %s3361_s22  ;;  %s2746_s18 = smov 116  }
   0xf   : > { %s2747_s19 = smov 112   ;;  %s2754_s20 = smov 127  }
  0x10   : > { %s2811_s26 = scalar_lea.vmem %s3345_s0, %s2381_s23  ;;  %s2755_s23 = smov 96  }
  0x11   : > { %v2814_v0 = vld [vmem:[%s2811_s26 + $0x10] sm:$0xff]  ;;  %v2817_v1 = vld [vmem:[%s2811_s26 + $0x18] sm:$0xff]  ;;  %v2820_v2 = vld [vmem:[%s2811_s26 + $0x20] sm:$0xff]  ;;  %s2756_s24 = smov 95   ;;  %s2757_s25 = smov 94  }
  0x12   : > { %v2824_v3 = vpack.i.bf16 %v2817_v1, %v2814_v0  ;;  %v2827_v4 = vld [vmem:[%s2811_s26 + $0x28] sm:$0xff]  ;;  %v2843_v7 = vld [vmem:[%s2811_s26 + $0x30] sm:$0xff]  ;;  %v2451_v9 = vpack.i.bf16 %v2820_v2, %v2817_v1  ;;  %v2888_v11 = vld [vmem:[%s2811_s26 + $0x38] sm:$0xff] }
  0x13   : > { %v2833_v5 = vpack.i.bf16 %v2827_v4, %v2820_v2  ;;  %v2838_v6 = vld [vmem:[%s2811_s26 + $0x8] sm:$0xff]  ;;  %v2849_v8 = vpack.i.bf16 %v2843_v7, %v2827_v4  ;;  %v2897_v13 = vld [vmem:[%s2811_s26] sm:$0xff] }
  0x14   : > { %2432 = vrot.lane.b32.xlu1 %v2824_v3, %s2731_s27  ;;  %2422 = vrot.lane.b32.xlu0 %v2824_v3, %s2732_s28  ;;  %v2521_v10 = vpack.i.bf16 %v2843_v7, %v2838_v6  ;;  %v2606_v12 = vpack.i.bf16 %v2814_v0, %v2838_v6  ;;  %v277_v15 = vld [vmem:[%s2811_s26 + $0x40] sm:$0xff] }
  0x15   : > { %v2621_v16 = vpack.i.bf16 %v277_v15, %v2888_v11 }
  0x18   : > { %2437 = vrot.lane.b32.xlu1 %v2833_v5, %s2731_s27  ;;  %2427 = vrot.lane.b32.xlu0 %v2833_v5, %s2732_s28 }
  0x1c   : > { %306 = vrot.lane.b32.xlu1 %v2838_v6, %s2731_s27  ;;  %283 = vrot.lane.b32.xlu0 %v2838_v6, %s2732_s28  ;;  %s2758_s27 = smov 64   ;;  %s2759_s28 = smov 63  }
  0x20   : > { %2447 = vrot.lane.b32.xlu1 %v2833_v5, %s2733_s29  ;;  %2442 = vrot.lane.b32.xlu0 %v2824_v3, %s2733_s29 }
  0x24   : > { %2457 = vrot.lane.b32.xlu1 %v2849_v8, %s2734_s30  ;;  %2452 = vrot.lane.b32.xlu0 %v2451_v9, %s2734_s30 }
  0x28   : > { %353 = vrot.lane.b32.xlu1 %v2814_v0, %s2734_s30  ;;  %329 = vrot.lane.b32.xlu0 %v2838_v6, %s2733_s29  ;;  %s2760_s29 = smov 62  }
  0x2c   : > { %2467 = vrot.lane.b32.xlu1 %v2849_v8, %s2735_s7  ;;  %2462 = vrot.lane.b32.xlu0 %v2451_v9, %s2735_s7 }
  0x30   : > { %2477 = vrot.lane.b32.xlu1 %v2849_v8, %s2736_s8  ;;  %2472 = vrot.lane.b32.xlu0 %v2451_v9, %s2736_s8 }
  0x34   : > { %399 = vrot.lane.b32.xlu1 %v2814_v0, %s2736_s8  ;;  %376 = vrot.lane.b32.xlu0 %v2814_v0, %s2735_s7 }
  0x38   : > { %2487 = vrot.lane.b32.xlu1 %v2849_v8, %s2737_s9  ;;  %2482 = vrot.lane.b32.xlu0 %v2451_v9, %s2737_s9 }
  0x3c   : > { %2497 = vrot.lane.b32.xlu1 %v2849_v8, %s2738_s10  ;;  %2492 = vrot.lane.b32.xlu0 %v2451_v9, %s2738_s10 }
  0x40   : > { %445 = vrot.lane.b32.xlu1 %v2814_v0, %s2738_s10  ;;  %422 = vrot.lane.b32.xlu0 %v2814_v0, %s2737_s9 }
  0x44   : > { %2507 = vrot.lane.b32.xlu1 %v2849_v8, %s2739_s11  ;;  %2502 = vrot.lane.b32.xlu0 %v2451_v9, %s2739_s11 }
  0x48   : > { %2517 = vrot.lane.b32.xlu1 %v2833_v5, %s2740_s12  ;;  %2512 = vrot.lane.b32.xlu0 %v2824_v3, %s2740_s12 }
  0x4c   : > { %2522 = vrot.lane.b32.xlu1 %v2521_v10, %s2740_s12  ;;  %468 = vrot.lane.b32.xlu0 %v2814_v0, %s2739_s11  ;;  %s2173_s11 = sshll.u32 %s3361_s22, 2 }
  0x50   : > { %2532 = vrot.lane.b32.xlu1 %v2833_v5, %s2741_s13  ;;  %2527 = vrot.lane.b32.xlu0 %v2824_v3, %s2741_s13 }
  0x54   : > { %2542 = vrot.lane.b32.xlu1 %v2833_v5, %s2742_s14  ;;  %2537 = vrot.lane.b32.xlu0 %v2824_v3, %s2742_s14 }
  0x58   : > { %2552 = vrot.lane.b32.xlu1 %v2521_v10, %s2742_s14  ;;  %2547 = vrot.lane.b32.xlu0 %v2521_v10, %s2741_s13  ;;  %s2750_s14 = smov 2  }
  0x5c   : > { %2562 = vrot.lane.b32.xlu1 %v2849_v8, %s2743_s15  ;;  %2557 = vrot.lane.b32.xlu0 %v2451_v9, %s2743_s15 }
  0x60   : > { %2567 = vrot.lane.b32.xlu1 %v2451_v9, %s2744_s16  ;;  %560 = vrot.lane.b32.xlu0 %v2814_v0, %s2743_s15  ;;  %s2751_s15 = smov 126  }
  0x64   : > { %587 = vrot.lane.b32.xlu1 %v2814_v0, %s2744_s16  ;;  %2572 = vrot.lane.b32.xlu0 %v2849_v8, %s2744_s16  ;;  %s2752_s16 = smov 33  }
  0x68   : > { %2582 = vrot.lane.b32.xlu1 %v2833_v5, %s2745_s17  ;;  %2577 = vrot.lane.b32.xlu0 %v2824_v3, %s2745_s17 }
  0x6c   : > { %657 = vrot.lane.b32.xlu1 %v2838_v6, %s2735_s7  ;;  %2587 = vrot.lane.b32.xlu0 %v2521_v10, %s2745_s17 }
  0x70   : > { %2597 = vrot.lane.b32.xlu1 %v2833_v5, %s2746_s18  ;;  %2592 = vrot.lane.b32.xlu0 %v2824_v3, %s2746_s18 }
  0x74   : > { %709 = vrot.lane.b32.xlu1 %v2888_v11, %s2745_s17  ;;  %2602 = vrot.lane.b32.xlu0 %v2521_v10, %s2746_s18  ;;  %s2753_s17 = smov 97  }
  0x78   : > { %725 = vrot.lane.b32.xlu1 %v2888_v11, %s2746_s18  ;;  %717 = vrot.lane.b32.xlu0 %v2888_v11, %s2735_s7 }
  0x7c   : > { %2612 = vrot.lane.b32.xlu1 %v2451_v9, %s2747_s19  ;;  %2607 = vrot.lane.b32.xlu0 %v2606_v12, %s2747_s19 }
  0x80   : > { %746 = vrot.lane.b32.xlu1 %v2897_v13, %s2747_s19  ;;  %738 = vrot.lane.b32.xlu0 %v2897_v13, %s2735_s7 }
  0x84   : > { %794 = vrot.lane.b32.xlu1 %v277_v15, %s2735_s7  ;;  %2617 = vrot.lane.b32.xlu0 %v2849_v8, %s2747_s19 }
  0x86   : > { %v2433_v17 = vpop.permute.xlu1 %2432  ;;  %v2423_v18 = vpop.permute.xlu0 %2422 }
  0x87   : > { %v2435_v19 = vunpack.i.h.bf16 %v2433_v17  ;;  %v2434_v20 = vunpack.i.l.bf16 %v2433_v17  ;;  %v2425_v21 = vunpack.i.h.bf16 %v2423_v18  ;;  %v2424_v22 = vunpack.i.l.bf16 %v2423_v18 }
  0x88   : > { %2622 = vrot.lane.b32.xlu0 %v2621_v16, %s2747_s19  ;;  %968 = vperm.xlu1 %2626, %v964_v43  }
  0x89   : > { %v295_v23 = vsel %vm293_vm0, %v2424_v22, %v2425_v21  ;;  %v318_v24 = vsel %vm316_vm1, %v2434_v20, %v2435_v19 }
  0x8a   : > { %v2438_v26 = vpop.permute.xlu1 %2437  ;;  %v2428_v27 = vpop.permute.xlu0 %2427  ;;  %v2189_v28 = vpack.c.bf16 %v318_v24, %v295_v23 }
  0x8b   : > { %v2440_v29 = vunpack.i.h.bf16 %v2438_v26  ;;  %v2439_v30 = vunpack.i.l.bf16 %v2438_v26  ;;  %v2430_v31 = vunpack.i.h.bf16 %v2428_v27  ;;  %v2429_v32 = vunpack.i.l.bf16 %v2428_v27 }
  0x8c   : > { %2190 = vmatprep.subr.bf16.mxu0 %v2189_v28 }
  0x8d   : > { %v297_v33 = vsel %vm293_vm0, %v2429_v32, %v2430_v31  ;;  %v320_v34 = vsel %vm316_vm1, %v2439_v30, %v2440_v29  ;;  %v296_v35 = vsel %vm293_vm0, %v2425_v21, %v2429_v32  ;;  %v319_v36 = vsel %vm316_vm1, %v2435_v19, %v2439_v30 }
  0x8e   : > { %v307_v37 = vpop.permute.xlu1 %306  ;;  %v284_v38 = vpop.permute.xlu0 %283  ;;  %v2261_v39 = vpack.c.bf16 %v320_v34, %v297_v33  ;;  %v2263_v40 = vpack.c.bf16 %v319_v36, %v296_v35 }
  0x8f   : > { %v317_v41 = vsel %vm316_vm1, %v307_v37, %v2434_v20  ;;  %v294_v42 = vsel %vm293_vm0, %v284_v38, %v2424_v22  ;;  %vm756_vm0 = vcmask 916480   ;;  %vm976_vm1 = vcmask 261120  }
  0x90   : > { %2262 = vmatprep.subr.bf16.mxu1 %v2261_v39  ;;  %v2191_v44 = vpack.c.bf16 %v317_v41, %v294_v42 }
  0x91   : > { %2264 = vmatpush1.bf16.msra.mxu1 %v2263_v40 }
  0x92   : > { %v2448_v46 = vpop.permute.xlu1 %2447  ;;  %2192 = vmatpush1.bf16.msra.mxu0 %v2191_v44  ;;  %v2443_v47 = vpop.permute.xlu0 %2442 }
  0x93   : > { %v2450_v48 = vunpack.i.h.bf16 %v2448_v46  ;;  %v2449_v49 = vunpack.i.l.bf16 %v2448_v46  ;;  %v2445_v50 = vunpack.i.h.bf16 %v2443_v47  ;;  %v2444_v51 = vunpack.i.l.bf16 %v2443_v47 }
  0x95   : > { %v343_v54 = vsel %vm339_vm2, %v2449_v49, %v2450_v48  ;;  %v341_v59 = vsel %vm339_vm2, %v2444_v51, %v2445_v50  ;;  %v342_v62 = vsel %vm339_vm2, %v2445_v50, %v2449_v49 }
  0x96   : > { %v2458_v52 = vpop.permute.xlu1 %2457  ;;  %v2453_v53 = vpop.permute.xlu0 %2452 }
  0x97   : > { %v2460_v55 = vunpack.i.h.bf16 %v2458_v52  ;;  %v2459_v56 = vunpack.i.l.bf16 %v2458_v52  ;;  %v2455_v57 = vunpack.i.h.bf16 %v2453_v53  ;;  %v2454_v58 = vunpack.i.l.bf16 %v2453_v53 }
  0x99   : > { %v365_v60 = vsel %vm363_vm3, %v2454_v58, %v2455_v57  ;;  %v367_v61 = vsel %vm363_vm3, %v2459_v56, %v2460_v55  ;;  %v366_v63 = vsel %vm363_vm3, %v2455_v57, %v2459_v56 }
  0x9a   : > { %v354_v3 = vpop.permute.xlu1 %353  ;;  %v330_v5 = vpop.permute.xlu0 %329  ;;  %v2193_v8 = vpack.c.bf16 %v365_v60, %v341_v59  ;;  %v2265_v9 = vpack.c.bf16 %v367_v61, %v343_v54  ;;  %v2267_v10 = vpack.c.bf16 %v366_v63, %v342_v62 }
  0x9b   : > { %v364_v12 = vsel %vm363_vm3, %v354_v3, %v2454_v58  ;;  %v340_v14 = vsel %vm339_vm2, %v330_v5, %v2444_v51  ;;  %vm1350_vm2 = vcmask 539648  }
  0x9c   : > { %v2195_v15 = vpack.c.bf16 %v364_v12, %v340_v14  ;;  %2194 = vmatprep.subr.bf16.mxu0 %v2193_v8  ;;  %2266 = vmatprep.subr.bf16.mxu1 %v2265_v9  ;;  %1351 = vst.msk [vmem:[#allocation3 + $0x20] sm:$0xff] %vm1350_vm2, %v2748_v25 }
  0x9d   : > { %2268 = vmatpush1.bf16.msra.mxu1 %v2267_v10 }
  0x9e   : > { %v2929_v16 = vpop.permute.xlu1 %2467  ;;  %v2463_v17 = vpop.permute.xlu0 %2462  ;;  %2196 = vmatpush1.bf16.msra.mxu0 %v2195_v15 }
  0x9f   : > { %v2470_v18 = vunpack.i.h.bf16 %v2929_v16  ;;  %v2469_v19 = vunpack.i.l.bf16 %v2929_v16  ;;  %v2465_v20 = vunpack.i.h.bf16 %v2463_v17  ;;  %v2464_v21 = vunpack.i.l.bf16 %v2463_v17 }
  0xa1   : > { %v2936_v22 = vsel %vm386_vm4, %v2469_v19, %v2470_v18  ;;  %v2939_v30 = vsel %vm386_vm4, %v2465_v20, %v2469_v19  ;;  %v2942_v31 = vsel %vm386_vm4, %v2464_v21, %v2465_v20 }
  0xa2   : > { %v2478_v23 = vpop.permute.xlu1 %2477  ;;  %v2473_v24 = vpop.permute.xlu0 %2472 }
  0xa3   : > { %v2480_v26 = vunpack.i.h.bf16 %v2478_v23  ;;  %v2479_v27 = vunpack.i.l.bf16 %v2478_v23  ;;  %v2475_v28 = vunpack.i.h.bf16 %v2473_v24  ;;  %v2474_v29 = vunpack.i.l.bf16 %v2473_v24 }
  0xa5   : > { %v411_v32 = vsel %vm409_vm5, %v2474_v29, %v2475_v28  ;;  %v413_v33 = vsel %vm409_vm5, %v2479_v27, %v2480_v26  ;;  %v412_v34 = vsel %vm409_vm5, %v2475_v28, %v2479_v27 }
  0xa6   : > { %v400_v35 = vpop.permute.xlu1 %399  ;;  %v2944_v36 = vpop.permute.xlu0 %376  ;;  %v2197_v37 = vpack.c.bf16 %v411_v32, %v2942_v31  ;;  %v2269_v38 = vpack.c.bf16 %v413_v33, %v2936_v22  ;;  %v2271_v39 = vpack.c.bf16 %v412_v34, %v2939_v30 }
  0xa7   : > { %v410_v40 = vsel %vm409_vm5, %v400_v35, %v2474_v29  ;;  %v2951_v41 = vsel %vm386_vm4, %v2944_v36, %v2464_v21 }
  0xa8   : > { %2198 = vmatprep.subr.bf16.mxu0 %v2197_v37  ;;  %2270 = vmatprep.subr.bf16.mxu1 %v2269_v38  ;;  %v2199_v42 = vpack.c.bf16 %v410_v40, %v2951_v41 }
  0xa9   : > { %2272 = vmatpush1.bf16.msra.mxu1 %v2271_v39 }
  0xaa   : > { %v2488_v43 = vpop.permute.xlu1 %2487  ;;  %v2483_v44 = vpop.permute.xlu0 %2482  ;;  %2200 = vmatpush1.bf16.msra.mxu0 %v2199_v42 }
  0xab   : > { %v2490_v45 = vunpack.i.h.bf16 %v2488_v43  ;;  %v2489_v46 = vunpack.i.l.bf16 %v2488_v43  ;;  %v2485_v47 = vunpack.i.h.bf16 %v2483_v44  ;;  %v2484_v48 = vunpack.i.l.bf16 %v2483_v44 }
  0xad   : > { %v436_v51 = vsel %vm432_vm6, %v2489_v46, %v2490_v45  ;;  %v434_v56 = vsel %vm432_vm6, %v2484_v48, %v2485_v47  ;;  %v435_v59 = vsel %vm432_vm6, %v2485_v47, %v2489_v46 }
  0xae   : > { %v2498_v49 = vpop.permute.xlu1 %2497  ;;  %v2493_v50 = vpop.permute.xlu0 %2492 }
  0xaf   : > { %v2500_v52 = vunpack.i.h.bf16 %v2498_v49  ;;  %v2499_v53 = vunpack.i.l.bf16 %v2498_v49  ;;  %v2495_v54 = vunpack.i.h.bf16 %v2493_v50  ;;  %v2494_v55 = vunpack.i.l.bf16 %v2493_v50 }
  0xb1   : > { %v457_v57 = vsel %vm455_vm7, %v2494_v55, %v2495_v54  ;;  %v459_v58 = vsel %vm455_vm7, %v2499_v53, %v2500_v52  ;;  %v458_v60 = vsel %vm455_vm7, %v2495_v54, %v2499_v53 }
  0xb2   : > { %v446_v61 = vpop.permute.xlu1 %445  ;;  %v423_v62 = vpop.permute.xlu0 %422  ;;  %v2201_v63 = vpack.c.bf16 %v457_v57, %v434_v56  ;;  %v2273_v3 = vpack.c.bf16 %v459_v58, %v436_v51  ;;  %v2275_v5 = vpack.c.bf16 %v458_v60, %v435_v59 }
  0xb3   : > { %v456_v8 = vsel %vm455_vm7, %v446_v61, %v2494_v55  ;;  %v433_v9 = vsel %vm432_vm6, %v423_v62, %v2484_v48 }
  0xb4   : > { %v2203_v10 = vpack.c.bf16 %v456_v8, %v433_v9  ;;  %2202 = vmatprep.subr.bf16.mxu0 %v2201_v63  ;;  %2274 = vmatprep.subr.bf16.mxu1 %v2273_v3 }
  0xb5   : > { %2276 = vmatpush1.bf16.msra.mxu1 %v2275_v5 }
  0xb6   : > { %v2508_v12 = vpop.permute.xlu1 %2507  ;;  %v2503_v14 = vpop.permute.xlu0 %2502  ;;  %2204 = vmatpush1.bf16.msra.mxu0 %v2203_v10 }
  0xb7   : > { %v2510_v15 = vunpack.i.h.bf16 %v2508_v12  ;;  %v2509_v17 = vunpack.i.l.bf16 %v2508_v12  ;;  %v2505_v19 = vunpack.i.h.bf16 %v2503_v14  ;;  %v2504_v20 = vunpack.i.l.bf16 %v2503_v14 }
  0xb9   : > { %v482_v24 = vsel %vm478_vm8, %v2509_v17, %v2510_v15  ;;  %v480_v32 = vsel %vm478_vm8, %v2504_v20, %v2505_v19  ;;  %v481_v35 = vsel %vm478_vm8, %v2505_v19, %v2509_v17 }
  0xba   : > { %v2962_v21 = vpop.permute.xlu1 %2517  ;;  %v2513_v23 = vpop.permute.xlu0 %2512 }
  0xbb   : > { %v2520_v26 = vunpack.i.h.bf16 %v2962_v21  ;;  %v2519_v27 = vunpack.i.l.bf16 %v2962_v21  ;;  %v2515_v28 = vunpack.i.h.bf16 %v2513_v23  ;;  %v2514_v29 = vunpack.i.l.bf16 %v2513_v23 }
  0xbd   : > { %v2969_v33 = vsel %vm501_vm9, %v2514_v29, %v2515_v28  ;;  %v2974_v34 = vsel %vm501_vm9, %v2519_v27, %v2520_v26  ;;  %v2978_v37 = vsel %vm501_vm9, %v2515_v28, %v2519_v27 }
  0xbe   : > { %v2980_v38 = vpop.permute.xlu1 %2522  ;;  %v469_v39 = vpop.permute.xlu0 %468  ;;  %v2205_v40 = vpack.c.bf16 %v2969_v33, %v480_v32  ;;  %v2277_v42 = vpack.c.bf16 %v2974_v34, %v482_v24  ;;  %v2279_v43 = vpack.c.bf16 %v2978_v37, %v481_v35 }
  0xbf   : > { %v2524_v44 = vunpack.i.l.bf16 %v2980_v38  ;;  %v479_v45 = vsel %vm478_vm8, %v469_v39, %v2504_v20 }
  0xc0   : > { %2206 = vmatprep.subr.bf16.mxu0 %v2205_v40  ;;  %2278 = vmatprep.subr.bf16.mxu1 %v2277_v42 }
  0xc1   : > { %v502_v46 = vsel %vm501_vm9, %v2524_v44, %v2514_v29  ;;  %2280 = vmatpush1.bf16.msra.mxu1 %v2279_v43 }
  0xc2   : > { %v2207_v47 = vpack.c.bf16 %v502_v46, %v479_v45  ;;  %v2988_v48 = vpop.permute.xlu1 %2532  ;;  %v2528_v49 = vpop.permute.xlu0 %2527 }
  0xc3   : > { %v2535_v50 = vunpack.i.h.bf16 %v2988_v48  ;;  %v2534_v51 = vunpack.i.l.bf16 %v2988_v48  ;;  %v2530_v52 = vunpack.i.h.bf16 %v2528_v49  ;;  %v2529_v53 = vunpack.i.l.bf16 %v2528_v49 }
  0xc4   : > { %2208 = vmatpush1.bf16.msra.mxu0 %v2207_v47 }
  0xc5   : > { %v528_v56 = vsel %vm524_vm10, %v2534_v51, %v2535_v50  ;;  %v526_v61 = vsel %vm524_vm10, %v2529_v53, %v2530_v52  ;;  %v527_v3 = vsel %vm524_vm10, %v2530_v52, %v2534_v51 }
  0xc6   : > { %v2992_v54 = vpop.permute.xlu1 %2542  ;;  %v2538_v55 = vpop.permute.xlu0 %2537 }
  0xc7   : > { %v2545_v57 = vunpack.i.h.bf16 %v2992_v54  ;;  %v2544_v58 = vunpack.i.l.bf16 %v2992_v54  ;;  %v2540_v59 = vunpack.i.h.bf16 %v2538_v55  ;;  %v2539_v60 = vunpack.i.l.bf16 %v2538_v55 }
  0xc9   : > { %v549_v62 = vsel %vm547_vm11, %v2539_v60, %v2540_v59  ;;  %v551_v63 = vsel %vm547_vm11, %v2544_v58, %v2545_v57  ;;  %v550_v5 = vsel %vm547_vm11, %v2540_v59, %v2544_v58 }
  0xca   : > { %v2553_v8 = vpop.permute.xlu1 %2552  ;;  %v2548_v9 = vpop.permute.xlu0 %2547  ;;  %v3006_v10 = vpack.c.bf16 %v549_v62, %v526_v61  ;;  %v3008_v12 = vpack.c.bf16 %v551_v63, %v528_v56  ;;  %v2221_v14 = vpack.c.bf16 %v550_v5, %v527_v3 }
  0xcb   : > { %v2554_v15 = vunpack.i.l.bf16 %v2553_v8  ;;  %v2549_v17 = vunpack.i.l.bf16 %v2548_v9  ;;  %v2555_v56 = vunpack.i.h.bf16 %v2553_v8  ;;  %v2550_v58 = vunpack.i.h.bf16 %v2548_v9 }
  0xcc   : > { %2210 = vmatprep.subr.bf16.mxu0 %v3006_v10  ;;  %2282 = vmatprep.subr.bf16.mxu1 %v3008_v12 }
  0xcd   : > { %2284 = vmatpush1.bf16.msra.mxu1 %v2221_v14  ;;  %v525_v19 = vsel %vm524_vm10, %v2549_v17, %v2529_v53  ;;  %v548_v20 = vsel %vm547_vm11, %v2554_v15, %v2539_v60  ;;  %v2525_v53 = vunpack.i.h.bf16 %v2980_v38  ;;  %v620_v17 = vsel %vm524_vm10, %v2535_v50, %v2550_v58 }
  0xce   : > { %v2563_v23 = vpop.permute.xlu1 %2562  ;;  %v2558_v24 = vpop.permute.xlu0 %2557  ;;  %v2211_v27 = vpack.c.bf16 %v548_v20, %v525_v19 }
  0xcf   : > { %v2565_v28 = vunpack.i.h.bf16 %v2563_v23  ;;  %v2564_v29 = vunpack.i.l.bf16 %v2563_v23  ;;  %v2560_v32 = vunpack.i.h.bf16 %v2558_v24  ;;  %v2559_v35 = vunpack.i.l.bf16 %v2558_v24 }
  0xd0   : > { %2212 = vmatpush1.bf16.msra.mxu0 %v2211_v27  ;;  %v612_v8 = vsel %vm501_vm9, %v2520_v26, %v2525_v53 }
  0xd1   : > { %v572_v39 = vsel %vm570_vm12, %v2559_v35, %v2560_v32  ;;  %v574_v40 = vsel %vm570_vm12, %v2564_v29, %v2565_v28  ;;  %v573_v42 = vsel %vm570_vm12, %v2560_v32, %v2564_v29 }
  0xd2   : > { %v2568_v43 = vpop.permute.xlu1 %2567  ;;  %v561_v44 = vpop.permute.xlu0 %560  ;;  %v2213_v45 = vpack.c.bf16 %v2942_v31, %v572_v39  ;;  %v2285_v46 = vpack.c.bf16 %v2936_v22, %v574_v40  ;;  %v2287_v47 = vpack.c.bf16 %v2939_v30, %v573_v42 }
  0xd3   : > { %v2570_v49 = vunpack.i.h.bf16 %v2568_v43  ;;  %v2569_v51 = vunpack.i.l.bf16 %v2568_v43  ;;  %v571_v52 = vsel %vm570_vm12, %v561_v44, %v2559_v35 }
  0xd4   : > { %v2215_v55 = vpack.c.bf16 %v2951_v41, %v571_v52  ;;  %2214 = vmatprep.subr.bf16.mxu0 %v2213_v45  ;;  %2286 = vmatprep.subr.bf16.mxu1 %v2285_v46 }
  0xd5   : > { %2288 = vmatpush1.bf16.msra.mxu1 %v2287_v47  ;;  %v599_v59 = vsel %vm597_vm13, %v2569_v51, %v2570_v49 }
  0xd6   : > { %v588_v60 = vpop.permute.xlu1 %587  ;;  %v2573_v61 = vpop.permute.xlu0 %2572  ;;  %2216 = vmatpush1.bf16.msra.mxu0 %v2215_v55  ;;  %v2217_v62 = vpack.c.bf16 %v2978_v37, %v599_v59  ;;  %v628_v37 = vsel %vm547_vm11, %v2545_v57, %v2555_v56 }
  0xd7   : > { %v598_v63 = vsel %vm597_vm13, %v588_v60, %v2569_v51  ;;  %v2575_v3 = vunpack.i.h.bf16 %v2573_v61  ;;  %v2574_v5 = vunpack.i.l.bf16 %v2573_v61  ;;  %v2293_v48 = vpack.c.bf16 %v628_v37, %v620_v17 }
  0xd8   : > { %v2219_v38 = vpack.c.bf16 %v2969_v33, %v598_v63  ;;  %2218 = vmatprep.subr.bf16.mxu0 %v2217_v62 }
  0xd9   : > { %v601_v9 = vsel %vm597_vm13, %v2574_v5, %v2575_v3  ;;  %v600_v15 = vsel %vm597_vm13, %v2570_v49, %v2574_v5 }
  0xda   : > { %v2583_v19 = vpop.permute.xlu1 %2582  ;;  %v2578_v20 = vpop.permute.xlu0 %2577  ;;  %2220 = vmatpush1.bf16.msra.mxu0 %v2219_v38  ;;  %v2289_v33 = vpack.c.bf16 %v612_v8, %v601_v9  ;;  %v2291_v21 = vpack.c.bf16 %v2974_v34, %v600_v15 }
  0xdb   : > { %v2585_v26 = vunpack.i.h.bf16 %v2583_v19  ;;  %v2584_v23 = vunpack.i.l.bf16 %v2583_v19  ;;  %v2580_v24 = vunpack.i.h.bf16 %v2578_v20  ;;  %v2579_v27 = vunpack.i.l.bf16 %v2578_v20  ;;  %2222 = vmatprep.subr.bf16.mxu0 %v2221_v14 }
  0xdc   : > { %2290 = vmatprep.subr.bf16.mxu1 %v2289_v33 }
  0xdd   : > { %2292 = vmatpush1.bf16.msra.mxu1 %v2291_v21  ;;  %v646_v50 = vsel %vm644_vm14, %v2579_v27, %v2580_v24  ;;  %v648_v54 = vsel %vm644_vm14, %v2584_v23, %v2585_v26  ;;  %v647_v32 = vsel %vm644_vm14, %v2580_v24, %v2584_v23 }
  0xde   : > { %v3041_v57 = vpop.permute.xlu1 %657  ;;  %v2588_v28 = vpop.permute.xlu0 %2587  ;;  %2224 = vmatpush1.bf16.msra.mxu0 %v3006_v10  ;;  %2294 = vmatprep.subr.bf16.mxu1 %v2293_v48  ;;  %v2225_v34 = vpack.c.bf16 %v2951_v41, %v646_v50  ;;  %v2237_v14 = vpack.c.bf16 %v2939_v30, %v648_v54  ;;  %v2239_v44 = vpack.c.bf16 %v2942_v31, %v647_v32 }
  0xdf   : > { %v2589_v29 = vunpack.i.l.bf16 %v2588_v28  ;;  %v3050_v35 = vsel %vm386_vm4, %v3041_v57, %v2944_v36  ;;  %v2590_v39 = vunpack.i.h.bf16 %v2588_v28 }
  0xe0   : > { %2226 = vmatprep.subr.bf16.mxu0 %v2225_v34 }
  0xe1   : > { %2296 = vmatpush1.bf16.msra.mxu1 %v3008_v12  ;;  %v645_v40 = vsel %vm644_vm14, %v2589_v29, %v2579_v27  ;;  %v690_v51 = vsel %vm644_vm14, %v2585_v26, %v2590_v39 }
  0xe2   : > { %v2598_v10 = vpop.permute.xlu1 %2597  ;;  %v2593_v42 = vpop.permute.xlu0 %2592  ;;  %2298 = vmatprep.subr.bf16.mxu1 %v2237_v14  ;;  %v2227_v43 = vpack.c.bf16 %v3050_v35, %v645_v40 }
  0xe3   : > { %v2600_v45 = vunpack.i.h.bf16 %v2598_v10  ;;  %v2599_v46 = vunpack.i.l.bf16 %v2598_v10  ;;  %v2595_v47 = vunpack.i.h.bf16 %v2593_v42  ;;  %v2594_v49 = vunpack.i.l.bf16 %v2593_v42 }
  0xe4   : > { %2228 = vmatpush1.bf16.msra.mxu0 %v2227_v43 }
  0xe5   : > { %2300 = vmatpush1.bf16.msra.mxu1 %v2239_v44  ;;  %v677_v36 = vsel %vm675_vm15, %v2594_v49, %v2595_v47  ;;  %v679_v12 = vsel %vm675_vm15, %v2599_v46, %v2600_v45  ;;  %v678_v52 = vsel %vm675_vm15, %v2595_v47, %v2599_v46 }
  0xe6   : > { %v710_v53 = vpop.permute.xlu1 %709  ;;  %v2603_v55 = vpop.permute.xlu0 %2602  ;;  %v2229_v56 = vpack.c.bf16 %v647_v32, %v677_v36  ;;  %v2301_v58 = vpack.c.bf16 %v690_v51, %v679_v12  ;;  %v2303_v59 = vpack.c.bf16 %v648_v54, %v678_v52  ;;  %v2233_v17 = vpack.c.bf16 %v678_v52, %v2942_v31 }
  0xe7   : > { %v2605_v60 = vunpack.i.h.bf16 %v2603_v55  ;;  %v2604_v61 = vunpack.i.l.bf16 %v2603_v55  ;;  %v711_v9 = vsel %vm644_vm14, %v2590_v39, %v710_v53  ;;  %v2307_v37 = vpack.c.bf16 %v679_v12, %v2939_v30 }
  0xe8   : > { %2230 = vmatprep.subr.bf16.mxu0 %v2229_v56  ;;  %2302 = vmatprep.subr.bf16.mxu1 %v2301_v58  ;;  %v2235_v16 = vpack.c.bf16 %v677_v36, %v2951_v41  ;;  %v2241_v28 = vpack.c.bf16 %v2838_v6, %v679_v12  ;;  %v2243_v10 = vpack.c.bf16 %v2897_v13, %v678_v52  ;;  %v814_v56 = vld [vmem:[%s3347_s2] sm:$0xff]  ;;  %vm1373_vm14 = vcmask 1047816  }
  0xe9   : > { %2304 = vmatpush1.bf16.msra.mxu1 %v2303_v59  ;;  %v676_v62 = vsel %vm675_vm15, %v2604_v61, %v2594_v49  ;;  %v702_v63 = vsel %vm675_vm15, %v2600_v45, %v2605_v60  ;;  %v2323_v52 = vpack.c.bf16 %v2939_v30, %v2820_v2  ;;  %v2251_v58 = vpack.c.bf16 %v2951_v41, %v2814_v0 }
  0xea   : > { %v726_v3 = vpop.permute.xlu1 %725  ;;  %v3062_v5 = vpop.permute.xlu0 %717  ;;  %v2231_v38 = vpack.c.bf16 %v646_v50, %v676_v62  ;;  %v2305_v8 = vpack.c.bf16 %v702_v63, %v2936_v22  ;;  %v2315_v34 = vpack.c.bf16 %v2814_v0, %v702_v63  ;;  %v817_v0 = vld [vmem:[%s3347_s2 + $0x18] sm:$0xff]  ;;  %v816_v63 = vld [vmem:[%s3347_s2 + $0x10] sm:$0xff] }
  0xeb   : > { %v3070_v15 = vsel %vm386_vm4, %v2470_v18, %v3062_v5  ;;  %v727_v20 = vsel %vm675_vm15, %v2605_v60, %v726_v3  ;;  %v2311_v18 = vpack.c.bf16 %v2936_v22, %v690_v51  ;;  %v818_v60 = vld [vmem:[%s3347_s2 + $0x20] sm:$0xff]  ;;  %vm1364_vm15 = vcmask 269312  }
  0xec   : > { %v2309_v19 = vpack.c.bf16 %v3070_v15, %v711_v9  ;;  %2232 = vmatpush1.bf16.msra.mxu0 %v2231_v38  ;;  %2306 = vmatprep.subr.bf16.mxu1 %v2305_v8  ;;  %v2313_v48 = vpack.c.bf16 %v2817_v1, %v727_v20 }
  0xed   : > { %2234 = vmatprep.subr.bf16.mxu0 %v2233_v17  ;;  %2308 = vmatpush1.bf16.msra.mxu1 %v2307_v37 }
  0xee   : > { %v2613_v33 = vpop.permute.xlu1 %2612  ;;  %v2608_v21 = vpop.permute.xlu0 %2607  ;;  %2310 = vmatprep.subr.bf16.mxu1 %v2309_v19 }
  0xef   : > { %v2615_v26 = vunpack.i.h.bf16 %v2613_v33  ;;  %v2614_v23 = vunpack.i.l.bf16 %v2613_v33  ;;  %v2610_v24 = vunpack.i.h.bf16 %v2608_v21  ;;  %v2609_v27 = vunpack.i.l.bf16 %v2608_v21 }
  0xf0   : > { %2236 = vmatpush1.bf16.msra.mxu0 %v2235_v16 }
  0xf1   : > { %2238 = vmatprep.subr.bf16.mxu0 %v2237_v14  ;;  %2312 = vmatpush1.bf16.msra.mxu1 %v2311_v18  ;;  %v760_v50 = vsel %vm756_vm0, %v2614_v23, %v2615_v26  ;;  %v758_v29 = vsel %vm756_vm0, %v2609_v27, %v2610_v24  ;;  %v759_v32 = vsel %vm756_vm0, %v2610_v24, %v2614_v23  ;;  %v1295_v24 = vlaneseq }
  0xf2   : > { %2314 = vmatprep.subr.bf16.mxu1 %v2313_v48  ;;  %v739_v54 = vpop.permute.xlu0 %738  ;;  %v747_v39 = vpop.permute.xlu1 %746  ;;  %v2317_v40 = vpack.c.bf16 %v760_v50, %v2942_v31  ;;  %v2245_v42 = vpack.c.bf16 %v758_v29, %v3050_v35  ;;  %v2319_v6 = vpack.c.bf16 %v759_v32, %v2951_v41  ;;  %v2253_v59 = vpack.c.bf16 %v2827_v4, %v760_v50 }
  0xf3   : > { %v757_v43 = vsel %vm756_vm0, %v747_v39, %v2609_v27  ;;  %v740_v45 = vsel %vm386_vm4, %v739_v54, %v3041_v57  ;;  %v2249_v57 = vpack.c.bf16 %v2942_v31, %v2817_v1  ;;  %v2255_v41 = vpack.c.bf16 %v2820_v2, %v759_v32  ;;  %v819_v2 = vld [vmem:[%s3347_s2 + $0x28] sm:$0xff] }
  0xf4   : > { %2240 = vmatpush1.bf16.msra.mxu0 %v2239_v44  ;;  %v2321_v44 = vpack.c.bf16 %v2936_v22, %v2827_v4  ;;  %v2247_v13 = vpack.c.bf16 %v757_v43, %v740_v45  ;;  %v1296_v27 = vand.u32 127, %v1295_v24 }
  0xf5   : > { %2242 = vmatprep.subr.bf16.mxu0 %v2241_v28  ;;  %2316 = vmatpush1.bf16.msra.mxu1 %v2315_v34 }
  0xf6   : > { %2318 = vmatprep.subr.bf16.mxu1 %v2317_v40  ;;  %v2618_v14 = vpop.permute.xlu0 %2617  ;;  %v795_v53 = vpop.permute.xlu1 %794  ;;  %v1297_v54 = vadd.s32 128, %v1296_v27  ;;  %v3146_v28 = vand.u32 31, %v1296_v27  ;;  %v1298_v34 = vadd.s32 256, %v1296_v27  ;;  %v1299_v39 = vadd.s32 384, %v1296_v27 }
  0xf7   : > { %v2620_v46 = vunpack.i.h.bf16 %v2618_v14  ;;  %v2619_v47 = vunpack.i.l.bf16 %v2618_v14  ;;  %v796_v1 = vsel %vm386_vm4, %v3062_v5, %v795_v53  ;;  %vm1325_vm3 = vcmp.lt.s32.totalorder %v1296_v27, 2 }
  0xf8   : > { %2244 = vmatpush1.bf16.msra.mxu0 %v2243_v10  ;;  %v3149_v40 = vand.u32 31, %v1297_v54  ;;  %vm1312_vm5 = vcmp.lt.s32.totalorder %v1296_v27, 126  ;;  %vm1334_vm6 = vcmp.eq.s32.totalorder %v3146_v28, 24  ;;  %v3153_v10 = vand.u32 31, %v1298_v34 }
  0xf9   : > { %2246 = vmatprep.subr.bf16.mxu0 %v2245_v42  ;;  %2320 = vmatpush1.bf16.msra.mxu1 %v2319_v6  ;;  %v782_v49 = vsel %vm756_vm0, %v2619_v47, %v2620_v46  ;;  %v781_v55 = vsel %vm756_vm0, %v2615_v26, %v2619_v47  ;;  %vm1330_vm7 = vcmp.eq.s32.totalorder %v3146_v28, 7  ;;  %v3156_v43 = vand.u32 31, %v1299_v39 }
  0xfa   : > { %2322 = vmatprep.subr.bf16.mxu1 %v2321_v44  ;;  %v2623_v35 = vpop.permute.xlu0 %2622  ;;  %v2325_v36 = vpack.c.bf16 %v2888_v11, %v782_v49  ;;  %v2327_v31 = vpack.c.bf16 %v2843_v7, %v781_v55  ;;  %v2257_v7 = vpack.c.bf16 %v782_v49, %v2936_v22  ;;  %v2259_v3 = vpack.c.bf16 %v781_v55, %v2939_v30 }
  0xfb   : > { %v2625_v12 = vunpack.i.h.bf16 %v2623_v35  ;;  %v2624_v51 = vunpack.i.l.bf16 %v2623_v35  ;;  %vm1335_vm8 = vcmp.eq.s32.totalorder %v3149_v40, 24  ;;  %vm1331_vm9 = vcmp.eq.s32.totalorder %v3149_v40, 7 }
  0xfc   : > { %2248 = vmatpush1.bf16.msra.mxu0 %v2247_v13  ;;  %vm1336_vm10 = vcmp.eq.s32.totalorder %v3153_v10, 24  ;;  %vm1332_vm11 = vcmp.eq.s32.totalorder %v3153_v10, 7  ;;  %vm1337_vm12 = vcmp.eq.s32.totalorder %v3156_v43, 24  ;;  %vm1333_vm13 = vcmp.eq.s32.totalorder %v3156_v43, 7 }
  0xfd   : > { %2250 = vmatprep.subr.bf16.mxu0 %v2249_v57  ;;  %2324 = vmatpush1.bf16.msra.mxu1 %v2323_v52  ;;  %v807_v11 = vsel %vm756_vm0, %v2624_v51, %v2625_v12  ;;  %v806_v61 = vsel %vm756_vm0, %v2620_v46, %v2624_v51  ;;  %vm1387_vm0 = vcmask 531720   ;;  %vm1850_vm2 = vcmp.ge.s32.totalorder %v3146_v28, 8 }
  0xfe   : > { %2326 = vmatprep.subr.bf16.mxu1 %v2325_v36  ;;  %v2329_v62 = vpack.c.bf16 %v807_v11, %v796_v1  ;;  %v2331_v4 = vpack.c.bf16 %v806_v61, %v3070_v15 }
 0x100   : > { %2252 = vmatpush1.bf16.msra.mxu0 %v2251_v58  ;;  %1202 = vmatmul.mubr.f32.vlgmr.msra.gmra.mrb[0].mxu1 %v814_v56  ;;  %v965_v58 = vld [vmem:[%s3348_s3 + $0x8] sm:$0xff] }
 0x101   : > { %2254 = vmatprep.subr.bf16.mxu0 %v2253_v59  ;;  %2328 = vmatpush1.bf16.msra.mxu1 %v2327_v31 }
 0x102   : > { %2330 = vmatprep.subr.bf16.mxu1 %v2329_v62  ;;  %1207 = vmatprep.mubr.f32.mxu1 %v818_v60 }
 0x103   : > { %1048 = vmatmul.mubr.f32.vlgmr.msra.gmra.mrb[0].mxu0 %v814_v56 }
 0x104   : > { %2256 = vmatpush1.bf16.msra.mxu0 %v2255_v41  ;;  %1208 = vmatmul.mubr.f32.gmra.mrb[2].mxu1 %v817_v0 }
 0x105   : > { %2258 = vmatprep.subr.bf16.mxu0 %v2257_v7  ;;  %2332 = vmatpush1.bf16.msra.mxu1 %v2331_v4 }
 0x106   : > { %1053 = vmatprep.mubr.f32.mxu0 %v818_v60  ;;  %1278 = vmatprep.mubr.f32.mxu1 %v2748_v25 }
 0x107   : > { %1054 = vmatmul.mubr.f32.gmra.mrb[2].mxu0 %v817_v0  ;;  %v969_v5 = vpop.permute.xlu1 %968 }
 0x108   : > { %2260 = vmatpush1.bf16.msra.mxu0 %v2259_v3  ;;  %2178 = vmatmul.mubr.msk.f32.vlgmr.msra.gmra.mrb[0].mxu1 %vm976_vm1, %v816_v63 }
 0x109   : > { %1124 = vmatprep.mubr.f32.mxu0 %v2748_v25  ;;  %1284 = vmatprep.mubr.f32.mxu1 %v2748_v25 }
 0x10b   : > { %2176 = vmatmul.mubr.msk.f32.vlgmr.msra.gmra.mrb[0].mxu0 %vm976_vm1, %v816_v63 }
 0x10c   : > { %2179 = vmatmul.mubr.msk.f32.gmra.mrb[2].mxu1 %vm976_vm1, %v819_v2  ;;  %1130 = vmatprep.mubr.f32.mxu0 %v2748_v25 }
 0x10d   : > { %1843 = vmatprep.mubr.f32.mxu1 %v2748_v25 }
 0x10f   : > { %2177 = vmatmul.mubr.msk.f32.gmra.mrb[2].mxu0 %vm976_vm1, %v819_v2  ;;  %vm1382_vm1 = vcmask 269320  }
 0x110   : > { %1772 = vmatprep.mubr.f32.mxu0 %v2748_v25 }
 0x1db   : > { %v1280_v22 = vpop.f32.mrb[0].mxu1 }
 0x1dc   : > { %v1282_v30 = vpop.f32.mrb[1].mxu1  ;;  %v2369_v19 = vadd.f32 %v1280_v22, %v969_v5 }
 0x1dd   : > { %v2370_v33 = vadd.f32 %v1282_v30, %v969_v5  ;;  %v1993_v30 = vshrl.u32 %v1295_v24, 7 }
 0x1de   : > { %v1126_v38 = vpop.f32.mrb[0].mxu0  ;;  %v1293_v26 = vmax.f32 %v2369_v19, 0.0 }
 0x1df   : > { %v2365_v8 = vadd.f32 %v1126_v38, %v969_v5  ;;  %v1128_v9 = vpop.f32.mrb[1].mxu0  ;;  %v3133_v15 = vpop.f32.mrb[2].mxu1  ;;  %v1294_v23 = vmax.f32 %v2370_v33, 0.0 }
 0x1e0   : > { %v2366_v17 = vadd.f32 %v1128_v9, %v969_v5  ;;  %v3135_v37 = vpop.f32.mrb[3].mxu1 }
 0x1e1   : > { %v1291_v20 = vmax.f32 %v2365_v8, 0.0  ;;  %v1998_v8 = vsub.s32 1, %v1993_v30 }
 0x1e2   : > { %v1292_v21 = vmax.f32 %v2366_v17, 0.0  ;;  %v3137_v16 = vpop.f32.mrb[2].mxu0 }
 0x1e3   : > { %v3139_v18 = vpop.f32.mrb[3].mxu0  ;;  %1317 = vrot.lane.b32.xlu0 %v1291_v20, %s2750_s14 }
 0x1e4   : > { %1319 = vrot.lane.b32.xlu1 %v1292_v21, %s2750_s14 }
 0x1e7   : > { %1321 = vrot.lane.b32.xlu0 %v1293_v26, %s2750_s14 }
 0x1e8   : > { %1323 = vrot.lane.b32.xlu1 %v1294_v23, %s2750_s14  ;;  %s263_s14 = scalar_lea.vmem %s3346_s1, %s2173_s11 }
 0x1eb   : > { %1304 = vrot.lane.b32.xlu0 %v1291_v20, %s2751_s15 }
 0x1ec   : > { %1306 = vrot.lane.b32.xlu1 %v1292_v21, %s2751_s15 }
 0x1ef   : > { %1308 = vrot.lane.b32.xlu0 %v1293_v26, %s2751_s15 }
 0x1f0   : > { %1310 = vrot.lane.b32.xlu1 %v1294_v23, %s2751_s15 }
 0x255   : > { %v1318_v48 = vpop.permute.xlu0 %1317 }
 0x256   : > { %v1320_v50 = vpop.permute.xlu1 %1319 }
 0x257   : > { %v1328_v45 = vsel %vm1325_vm3, %v1318_v48, %v1320_v50 }
 0x258   : > { %v1339_v36 = vsel %vm1335_vm8, %v1328_v45, %v1292_v21 }
 0x259   : > { %v1322_v29 = vpop.permute.xlu0 %1321 }
 0x25a   : > { %v1324_v32 = vpop.permute.xlu1 %1323  ;;  %v1327_v47 = vsel %vm1325_vm3, %v1320_v50, %v1322_v29 }
 0x25b   : > { %v1329_v14 = vsel %vm1325_vm3, %v1324_v32, %v1318_v48  ;;  %v1326_v12 = vsel %vm1325_vm3, %v1322_v29, %v1324_v32  ;;  %v1340_v52 = vsel %vm1336_vm10, %v1327_v47, %v1293_v26  ;;  %vm1854_vm3 = vcmp.lt.s32.totalorder %v3146_v28, 24 }
 0x25c   : > { %v1338_v46 = vsel %vm1334_vm6, %v1329_v14, %v1291_v20  ;;  %v1341_v56 = vsel %vm1337_vm12, %v1326_v12, %v1294_v23  ;;  %vm1855_vm6 = vcmp.lt.s32.totalorder %v3149_v40, 24  ;;  %vm1856_vm10 = vcmp.lt.s32.totalorder %v3153_v10, 24 }
 0x25d   : > { %v1305_v42 = vpop.permute.xlu0 %1304  ;;  %vm1853_vm12 = vcmp.ge.s32.totalorder %v3156_v43, 8  ;;  %v1994_v20 = vsub.s32 0, %v1993_v30 }
 0x25e   : > { %v1307_v6 = vpop.permute.xlu1 %1306 }
 0x25f   : > { %v1315_v25 = vsel %vm1312_vm5, %v1305_v42, %v1307_v6 }
 0x260   : > { %v1342_v44 = vsel %vm1330_vm7, %v1315_v25, %v1338_v46  ;;  %vm3203_vm7 = vmand %vm1850_vm2, %vm1854_vm3  ;;  %vm1516_vm2 = vcmask 777216   ;;  %vm1549_vm3 = vcmask 769024  }
 0x261   : > { %1356 = vrot.lane.b32.xlu0 %v1342_v44, %s2752_s16  ;;  %v1309_v49 = vpop.permute.xlu0 %1308 }
 0x262   : > { %v1314_v13 = vsel %vm1312_vm5, %v1307_v6, %v1309_v49  ;;  %v1311_v35 = vpop.permute.xlu1 %1310 }
 0x263   : > { %v1313_v51 = vsel %vm1312_vm5, %v1309_v49, %v1311_v35  ;;  %v1343_v57 = vsel %vm1331_vm9, %v1314_v13, %v1339_v36  ;;  %v1316_v53 = vsel %vm1312_vm5, %v1311_v35, %v1305_v42  ;;  %vm1851_vm5 = vcmp.ge.s32.totalorder %v3149_v40, 8 }
 0x264   : > { %1358 = vrot.lane.b32.xlu1 %v1343_v57, %s2752_s16  ;;  %v1344_v55 = vsel %vm1332_vm11, %v1313_v51, %v1340_v52  ;;  %v1345_v11 = vsel %vm1333_vm13, %v1316_v53, %v1341_v56  ;;  %vm3213_vm8 = vmand %vm1851_vm5, %vm1855_vm6  ;;  %vm1852_vm9 = vcmp.ge.s32.totalorder %v3153_v10, 8  ;;  %vm1857_vm13 = vcmp.lt.s32.totalorder %v3156_v43, 24 }
 0x265   : > { %1360 = vrot.lane.b32.xlu0 %v1344_v55, %s2752_s16  ;;  %vm3228_vm11 = vmand %vm1852_vm9, %vm1856_vm10  ;;  %vm1582_vm5 = vcmask 523264   ;;  %vm1615_vm6 = vcmask 515072   ;;  %vm1648_vm9 = vcmask 506880   ;;  %vm1704_vm10 = vcmask 588800  }
 0x268   : > { %1362 = vrot.lane.b32.xlu1 %v1345_v11, %s2752_s16 }
 0x269   : > { %1384 = vrot.lane.b32.xlu0 %v1345_v11, %s2753_s17 }
 0x26c   : > { %1379 = vrot.lane.b32.xlu1 %v1342_v44, %s2753_s17 }
 0x26d   : > { %973 = vperm.xlu0 %2627, %v965_v58  }
 0x2d3   : > { %v1357_v1 = vpop.permute.xlu0 %1356 }
 0x2d4   : > { %1374 = vst.msk [vmem:[#allocation3] sm:$0xff] %vm1373_vm14, %v1357_v1  ;;  %vm3240_vm14 = vmand %vm1853_vm12, %vm1857_vm13 }
 0x2d6   : > { %v1359_v31 = vpop.permute.xlu1 %1358 }
 0x2d7   : > { %v3174_v59 = vsel %vm1364_vm15, %v1357_v1, %v1359_v31  ;;  %v1361_v60 = vpop.permute.xlu0 %1360 }
 0x2d8   : > { %v3176_v61 = vsel %vm1364_vm15, %v1359_v31, %v1361_v60 }
 0x2d9   : > { %v2628_v62 = vpack.i.bf16 %v3176_v61, %v3174_v59 }
 0x2da   : > { %v1363_v0 = vpop.permute.xlu1 %1362 }
 0x2db   : > { %v3180_v41 = vsel %vm1364_vm15, %v1361_v60, %v1363_v0  ;;  %1378 = vst.msk [vmem:[#allocation3 + $0x20] sm:$0xff] %vm1364_vm15, %v1363_v0  ;;  %v1385_v4 = vpop.permute.xlu0 %1384  ;;  %2629 = vrot.lane.b32.xlu1 %v2628_v62, %s2754_s20  ;;  %vm1417_vm15 = vcmask 1039360  }
 0x2dc   : > { %1388 = vst.msk [vmem:[#allocation3 + $0x20] sm:$0xff] %vm1387_vm0, %v1385_v4  ;;  %vm1450_vm0 = vcmask 1031168  }
 0x2de   : > { %v1380_v7 = vpop.permute.xlu1 %1379 }
 0x2df   : > { %1383 = vst.msk [vmem:[#allocation3] sm:$0xff] %vm1382_vm1, %v1380_v7  ;;  %vm1483_vm1 = vcmask 785408  }
 0x2e3   : > { %v1401_v63 = vld [vmem:[#allocation3 + $0x20] sm:$0xff] }
 0x2e4   : > { %v2633_v3 = vpack.i.bf16 %v1401_v63, %v3180_v41 }
 0x2e6   : > { %v3183_v2 = vld [vmem:[#allocation3] sm:$0xff]  ;;  %2634 = vrot.lane.b32.xlu1 %v2633_v3, %s2754_s20 }
 0x2e7   : > { %1407 = vrot.lane.b32.xlu0 %v3183_v2, %s2754_s20 }
 0x2ea   : > { %2639 = vrot.lane.b32.xlu1 %v2628_v62, %s2751_s15 }
 0x2eb   : > { %2644 = vrot.lane.b32.xlu0 %v2633_v3, %s2751_s15 }
 0x2ec   : > { %v974_v22 = vpop.permute.xlu0 %973 }
 0x2ed   : > { %v3208_v5 = vadd.f32 %v3137_v16, %v974_v22  ;;  %v3211_v38 = vadd.f32 %v3139_v18, %v974_v22  ;;  %v3226_v19 = vadd.f32 %v3133_v15, %v974_v22  ;;  %v3235_v21 = vadd.f32 %v3135_v37, %v974_v22  ;;  %v1698_v37 = vld [vmem:[%s3350_s5] sm:$0xff] }
 0x2ee   : > { %2649 = vrot.lane.b32.xlu1 %v2628_v62, %s2755_s23  ;;  %v2006_v18 = vsub.s32 3, %v1993_v30 }
 0x2ef   : > { %2654 = vrot.lane.b32.xlu0 %v2633_v3, %s2755_s23  ;;  %v1862_v9 = vsel %vm3203_vm7, %v3208_v5, 0.0  ;;  %v1863_v17 = vsel %vm3213_vm8, %v3211_v38, 0.0  ;;  %v1864_v16 = vsel %vm3228_vm11, %v3226_v19, 0.0  ;;  %v1865_v26 = vsel %vm3240_vm14, %v3235_v21, 0.0 }
 0x2f0   : > { %v1866_v33 = vadd.f32 %v1863_v17, %v1862_v9 }
 0x2f2   : > { %1440 = vrot.lane.b32.xlu1 %v3183_v2, %s2751_s15  ;;  %v1867_v15 = vadd.f32 %v1866_v33, %v1864_v16  ;;  %s2761_s15 = smov 8  }
 0x2f3   : > { %1473 = vrot.lane.b32.xlu0 %v3183_v2, %s2755_s23 }
 0x2f4   : > { %v1868_v23 = vadd.f32 %v1867_v15, %v1865_v26 }
 0x2f6   : > { %2659 = vrot.lane.b32.xlu1 %v2628_v62, %s2756_s24 }
 0x2f7   : > { %2664 = vrot.lane.b32.xlu0 %v2633_v3, %s2756_s24 }
 0x2fa   : > { %2669 = vrot.lane.b32.xlu1 %v2628_v62, %s2757_s25 }
 0x2fb   : > { %2674 = vrot.lane.b32.xlu0 %v2633_v3, %s2757_s25 }
 0x2fe   : > { %1506 = vrot.lane.b32.xlu1 %v3183_v2, %s2756_s24 }
 0x2ff   : > { %1539 = vrot.lane.b32.xlu0 %v3183_v2, %s2757_s25 }
 0x302   : > { %2679 = vrot.lane.b32.xlu1 %v2628_v62, %s2758_s27 }
 0x303   : > { %2684 = vrot.lane.b32.xlu0 %v2633_v3, %s2758_s27 }
 0x306   : > { %2689 = vrot.lane.b32.xlu1 %v2628_v62, %s2759_s28 }
 0x307   : > { %2694 = vrot.lane.b32.xlu0 %v2633_v3, %s2759_s28 }
 0x30a   : > { %1572 = vrot.lane.b32.xlu1 %v3183_v2, %s2758_s27 }
 0x30b   : > { %1605 = vrot.lane.b32.xlu0 %v3183_v2, %s2759_s28 }
 0x30e   : > { %1640 = vrot.lane.b32.xlu1 %v3174_v59, %s2760_s29 }
 0x30f   : > { %1642 = vrot.lane.b32.xlu0 %v3176_v61, %s2760_s29 }
 0x312   : > { %1644 = vrot.lane.b32.xlu1 %v3180_v41, %s2760_s29 }
 0x313   : > { %1646 = vrot.lane.b32.xlu0 %v1401_v63, %s2760_s29 }
 0x316   : > { %1638 = vrot.lane.b32.xlu1 %v3183_v2, %s2760_s29 }
 0x332   : > { %1869 = vadd.xlane.f32.xlu0 %v1868_v23 }
 0x348   : > { %1701 = vperm.xlu0 %2627, %v1698_v37  }
 0x34d   : > { %v2630_v27 = vpop.permute.xlu1 %2629 }
 0x34e   : > { %v2632_v48 = vunpack.i.h.bf16 %v2630_v27  ;;  %v2631_v50 = vunpack.i.l.bf16 %v2630_v27 }
 0x350   : > { %v1419_v54 = vsel %vm1417_vm15, %v2631_v50, %v2632_v48 }
 0x351   : > { %v2333_v28 = vpack.c.bf16 %v1419_v54, %v3174_v59 }
 0x353   : > { %2334 = vmatprep.subr.bf16.mxu0 %v2333_v28 }
 0x358   : > { %v2635_v34 = vpop.permute.xlu1 %2634 }
 0x359   : > { %v2637_v29 = vunpack.i.h.bf16 %v2635_v34  ;;  %v2636_v32 = vunpack.i.l.bf16 %v2635_v34  ;;  %v1408_v39 = vpop.permute.xlu0 %1407 }
 0x35a   : > { %v1418_v40 = vsel %vm1417_vm15, %v1408_v39, %v2631_v50 }
 0x35b   : > { %v2335_v14 = vpack.c.bf16 %v1418_v40, %v3183_v2  ;;  %v1421_v10 = vsel %vm1417_vm15, %v2636_v32, %v2637_v29  ;;  %v1420_v42 = vsel %vm1417_vm15, %v2632_v48, %v2636_v32 }
 0x35c   : > { %v2640_v6 = vpop.permute.xlu1 %2639  ;;  %v2349_v43 = vpack.c.bf16 %v1421_v10, %v3180_v41  ;;  %v2351_v45 = vpack.c.bf16 %v1420_v42, %v3176_v61 }
 0x35d   : > { %2336 = vmatpush1.bf16.msra.mxu0 %v2335_v14  ;;  %v2645_v25 = vpop.permute.xlu0 %2644  ;;  %v2642_v46 = vunpack.i.h.bf16 %v2640_v6  ;;  %v2641_v47 = vunpack.i.l.bf16 %v2640_v6 }
 0x35e   : > { %2350 = vmatprep.subr.bf16.mxu1 %v2349_v43  ;;  %v2647_v44 = vunpack.i.h.bf16 %v2645_v25  ;;  %v2646_v49 = vunpack.i.l.bf16 %v2645_v25 }
 0x35f   : > { %2352 = vmatpush1.bf16.msra.mxu1 %v2351_v45  ;;  %v1452_v52 = vsel %vm1450_vm0, %v2641_v47, %v2642_v46 }
 0x360   : > { %v2650_v13 = vpop.permute.xlu1 %2649  ;;  %v1454_v55 = vsel %vm1450_vm0, %v2646_v49, %v2647_v44  ;;  %v1453_v1 = vsel %vm1450_vm0, %v2642_v46, %v2646_v49 }
 0x361   : > { %v2652_v35 = vunpack.i.h.bf16 %v2650_v13  ;;  %v2651_v36 = vunpack.i.l.bf16 %v2650_v13  ;;  %v2655_v12 = vpop.permute.xlu0 %2654 }
 0x362   : > { %v2657_v51 = vunpack.i.h.bf16 %v2655_v12  ;;  %v2656_v57 = vunpack.i.l.bf16 %v2655_v12 }
 0x363   : > { %v1485_v53 = vsel %vm1483_vm1, %v2651_v36, %v2652_v35 }
 0x364   : > { %v1441_v56 = vpop.permute.xlu1 %1440  ;;  %v2337_v11 = vpack.c.bf16 %v1485_v53, %v1452_v52  ;;  %v1487_v58 = vsel %vm1483_vm1, %v2656_v57, %v2657_v51  ;;  %v1486_v31 = vsel %vm1483_vm1, %v2652_v35, %v2656_v57 }
 0x365   : > { %v1451_v59 = vsel %vm1450_vm0, %v1441_v56, %v2641_v47  ;;  %v1474_v60 = vpop.permute.xlu0 %1473  ;;  %v2353_v61 = vpack.c.bf16 %v1487_v58, %v1454_v55  ;;  %v2355_v62 = vpack.c.bf16 %v1486_v31, %v1453_v1 }
 0x366   : > { %v1484_v0 = vsel %vm1483_vm1, %v1474_v60, %v2651_v36  ;;  %2338 = vmatprep.subr.bf16.mxu0 %v2337_v11 }
 0x367   : > { %v2339_v41 = vpack.c.bf16 %v1484_v0, %v1451_v59  ;;  %2354 = vmatprep.subr.bf16.mxu1 %v2353_v61 }
 0x368   : > { %2356 = vmatpush1.bf16.msra.mxu1 %v2355_v62  ;;  %v2660_v4 = vpop.permute.xlu1 %2659 }
 0x369   : > { %2340 = vmatpush1.bf16.msra.mxu0 %v2339_v41  ;;  %v2665_v7 = vpop.permute.xlu0 %2664  ;;  %v2662_v63 = vunpack.i.h.bf16 %v2660_v4  ;;  %v2661_v3 = vunpack.i.l.bf16 %v2660_v4 }
 0x36a   : > { %v2667_v2 = vunpack.i.h.bf16 %v2665_v7  ;;  %v2666_v22 = vunpack.i.l.bf16 %v2665_v7 }
 0x36b   : > { %v1518_v23 = vsel %vm1516_vm2, %v2661_v3, %v2662_v63 }
 0x36c   : > { %v2670_v9 = vpop.permute.xlu1 %2669  ;;  %v1520_v27 = vsel %vm1516_vm2, %v2666_v22, %v2667_v2  ;;  %v1519_v28 = vsel %vm1516_vm2, %v2662_v63, %v2666_v22 }
 0x36d   : > { %v2672_v17 = vunpack.i.h.bf16 %v2670_v9  ;;  %v2671_v33 = vunpack.i.l.bf16 %v2670_v9  ;;  %v2675_v16 = vpop.permute.xlu0 %2674 }
 0x36e   : > { %v2677_v15 = vunpack.i.h.bf16 %v2675_v16  ;;  %v2676_v26 = vunpack.i.l.bf16 %v2675_v16 }
 0x36f   : > { %v1551_v37 = vsel %vm1549_vm3, %v2671_v33, %v2672_v17 }
 0x370   : > { %v1507_v48 = vpop.permute.xlu1 %1506  ;;  %v2341_v50 = vpack.c.bf16 %v1551_v37, %v1518_v23  ;;  %v1553_v54 = vsel %vm1549_vm3, %v2676_v26, %v2677_v15  ;;  %v1552_v34 = vsel %vm1549_vm3, %v2672_v17, %v2676_v26 }
 0x371   : > { %v1517_v29 = vsel %vm1516_vm2, %v1507_v48, %v2661_v3  ;;  %v1540_v32 = vpop.permute.xlu0 %1539  ;;  %v2357_v39 = vpack.c.bf16 %v1553_v54, %v1520_v27  ;;  %v2359_v40 = vpack.c.bf16 %v1552_v34, %v1519_v28  ;;  %v1661_v3 = vld [vmem:[%s3349_s4] sm:$0xff] }
 0x372   : > { %v1550_v14 = vsel %vm1549_vm3, %v1540_v32, %v2671_v33  ;;  %2342 = vmatprep.subr.bf16.mxu0 %v2341_v50 }
 0x373   : > { %v2343_v10 = vpack.c.bf16 %v1550_v14, %v1517_v29  ;;  %2358 = vmatprep.subr.bf16.mxu1 %v2357_v39 }
 0x374   : > { %2360 = vmatpush1.bf16.msra.mxu1 %v2359_v40  ;;  %v2680_v42 = vpop.permute.xlu1 %2679  ;;  %v2002_v40 = vsub.s32 2, %v1993_v30 }
 0x375   : > { %2344 = vmatpush1.bf16.msra.mxu0 %v2343_v10  ;;  %v2685_v6 = vpop.permute.xlu0 %2684  ;;  %v2682_v43 = vunpack.i.h.bf16 %v2680_v42  ;;  %v2681_v45 = vunpack.i.l.bf16 %v2680_v42 }
 0x376   : > { %v2687_v25 = vunpack.i.h.bf16 %v2685_v6  ;;  %v2686_v46 = vunpack.i.l.bf16 %v2685_v6 }
 0x377   : > { %v1584_v12 = vsel %vm1582_vm5, %v2681_v45, %v2682_v43 }
 0x378   : > { %v2690_v47 = vpop.permute.xlu1 %2689  ;;  %v1586_v57 = vsel %vm1582_vm5, %v2686_v46, %v2687_v25  ;;  %v1585_v56 = vsel %vm1582_vm5, %v2682_v43, %v2686_v46 }
 0x379   : > { %v2692_v44 = vunpack.i.h.bf16 %v2690_v47  ;;  %v2691_v49 = vunpack.i.l.bf16 %v2690_v47  ;;  %v2695_v13 = vpop.permute.xlu0 %2694 }
 0x37a   : > { %v2697_v35 = vunpack.i.h.bf16 %v2695_v13  ;;  %v2696_v36 = vunpack.i.l.bf16 %v2695_v13 }
 0x37b   : > { %v1617_v51 = vsel %vm1615_vm6, %v2691_v49, %v2692_v44 }
 0x37c   : > { %v1573_v52 = vpop.permute.xlu1 %1572  ;;  %v2345_v53 = vpack.c.bf16 %v1617_v51, %v1584_v12  ;;  %v1619_v55 = vsel %vm1615_vm6, %v2696_v36, %v2697_v35  ;;  %v1618_v11 = vsel %vm1615_vm6, %v2692_v44, %v2696_v36 }
 0x37d   : > { %v1583_v58 = vsel %vm1582_vm5, %v1573_v52, %v2681_v45  ;;  %v1606_v1 = vpop.permute.xlu0 %1605  ;;  %v2361_v31 = vpack.c.bf16 %v1619_v55, %v1586_v57  ;;  %v2363_v59 = vpack.c.bf16 %v1618_v11, %v1585_v56 }
 0x37e   : > { %v1616_v60 = vsel %vm1615_vm6, %v1606_v1, %v2691_v49  ;;  %2346 = vmatprep.subr.bf16.mxu0 %v2345_v53 }
 0x37f   : > { %v2347_v61 = vpack.c.bf16 %v1616_v60, %v1583_v58  ;;  %2362 = vmatprep.subr.bf16.mxu1 %v2361_v31 }
 0x380   : > { %2364 = vmatpush1.bf16.msra.mxu1 %v2363_v59  ;;  %v1641_v62 = vpop.permute.xlu1 %1640 }
 0x381   : > { %2348 = vmatpush1.bf16.msra.mxu0 %v2347_v61  ;;  %v1643_v0 = vpop.permute.xlu0 %1642 }
 0x382   : > { %v1650_v41 = vsel %vm1648_vm9, %v1641_v62, %v1643_v0 }
 0x383   : > { %1724 = vmatprep.subr.mxu0 %v1650_v41 }
 0x384   : > { %v1645_v4 = vpop.permute.xlu1 %1644 }
 0x385   : > { %v1647_v7 = vpop.permute.xlu0 %1646  ;;  %v1651_v2 = vsel %vm1648_vm9, %v1643_v0, %v1645_v4 }
 0x386   : > { %v1652_v63 = vsel %vm1648_vm9, %v1645_v4, %v1647_v7 }
 0x387   : > { %1795 = vmatprep.subr.mxu1 %v1652_v63 }
 0x388   : > { %1796 = vmatpush1.msra.mxu1 %v1651_v2  ;;  %v1639_v22 = vpop.permute.xlu1 %1638 }
 0x389   : > { %v1649_v9 = vsel %vm1648_vm9, %v1639_v22, %v1641_v62  ;;  %2181 = vmatmul.mubr.msk.f32.vlgmr.msra.gmra.mrb[4].mxu1 %vm1704_vm10, %v1661_v3 }
 0x38a   : > { %1725 = vmatpush1.msra.mxu0 %v1649_v9 }
 0x38b   : > { %2180 = vmatmul.mubr.msk.f32.vlgmr.msra.gmra.mrb[4].mxu0 %vm1704_vm10, %v1661_v3 }
 0x3bf   : > { %v1870_v17 = vpop.xlane.xlu0 %1869 }
 0x3c0   : > { %v1871_v33 = vmul.f32 0.00390625, %v1870_v17 }
 0x3c2   : > { %v1872_v16 = vsub.f32 %v3208_v5, %v1871_v33  ;;  %v1873_v15 = vsub.f32 %v3211_v38, %v1871_v33  ;;  %v1874_v26 = vsub.f32 %v3226_v19, %v1871_v33  ;;  %v1875_v23 = vsub.f32 %v3235_v21, %v1871_v33  ;;  %v1990_v21 = vld [vmem:[%s263_s14] sm:$0xf] }
 0x3c3   : > { %v1999_v32 = vrot.slane %v1990_v21, %v1998_v8  ;;  %v1995_v39 = vrot.slane %v1990_v21, %v1994_v20  ;;  %v2007_v14 = vrot.slane %v1990_v21, %v2006_v18  ;;  %v2003_v10 = vrot.slane %v1990_v21, %v2002_v40 }
 0x3c4   : > { %v1876_v37 = vsel %vm3203_vm7, %v1872_v16, 0.0  ;;  %v1877_v27 = vsel %vm3213_vm8, %v1873_v15, 0.0  ;;  %v1878_v48 = vsel %vm3228_vm11, %v1874_v26, 0.0  ;;  %v1879_v5 = vsel %vm3240_vm14, %v1875_v23, 0.0 }
 0x3c5   : > { %v1880_v50 = vmul.f32 %v1876_v37, %v1876_v37  ;;  %v1881_v54 = vmul.f32 %v1877_v27, %v1877_v27  ;;  %v1882_v38 = vmul.f32 %v1878_v48, %v1878_v48  ;;  %v1883_v34 = vmul.f32 %v1879_v5, %v1879_v5  ;;  %2010 = vrot.lane.b32.xlu0 %v1999_v32, %s2761_s15 }
 0x3c6   : > { %v2029_v24 = vsub.f32 1.0, %v1990_v21  ;;  %v1899_v53 = vmul.f32 10.0, %v1872_v16  ;;  %v1900_v55 = vmul.f32 10.0, %v1873_v15  ;;  %v1901_v56 = vmul.f32 10.0, %v1874_v26 }
 0x3c7   : > { %v1884_v28 = vadd.f32 %v1881_v54, %v1880_v50  ;;  %v1902_v11 = vmul.f32 10.0, %v1875_v23  ;;  %v1702_v50 = vpop.permute.xlu0 %1701  ;;  %vm1947_vm11 = vcmask 64512  }
 0x3c8   : > { %v2038_v42 = vrot.slane %v2029_v24, %v1998_v8  ;;  %v2034_v6 = vrot.slane %v2029_v24, %v1994_v20  ;;  %v3296_v43 = vrot.slane %v2029_v24, %v2006_v18  ;;  %v3298_v45 = vrot.slane %v2029_v24, %v2002_v40 }
 0x3c9   : > { %v1885_v19 = vadd.f32 %v1884_v28, %v1882_v38  ;;  %2014 = vrot.lane.b32.xlu0 %v2007_v14, %s2761_s15 }
 0x3cb   : > { %v1886_v29 = vadd.f32 %v1885_v19, %v1883_v34 }
 0x3cd   : > { %1887 = vadd.xlane.f32.xlu1 %v1886_v29  ;;  %2049 = vrot.lane.b32.xlu0 %v2038_v42, %s2761_s15 }
 0x3de   : > { %2008 = vrot.lane.b32.xlu1 %v1995_v39, %s2761_s15 }
 0x3e2   : > { %2012 = vrot.lane.b32.xlu1 %v2003_v10, %s2761_s15 }
 0x3e6   : > { %2047 = vrot.lane.b32.xlu1 %v2034_v6, %s2761_s15 }
 0x437   : > { %v2011_v24 = vpop.permute.xlu0 %2010 }
 0x43b   : > { %v2015_v6 = vpop.permute.xlu0 %2014 }
 0x45a   : > { %v1888_v25 = vpop.xlane.xlu1 %1887 }
 0x45b   : > { %v1889_v46 = vmul.f32 0.003921569, %v1888_v25 }
 0x45c   : > { %v1845_v47 = vpop.f32.mrb[4].mxu1 }
 0x45d   : > { %v1847_v44 = vpop.f32.mrb[5].mxu1  ;;  %2698 = vrsqrt.f32 %v1889_v46  ;;  %vm1892_vm7 = vcmp.eq.f32.partialorder %v1889_v46, inf  ;;  %v1895_v12 = vand.u32 2147483648, %v1889_v46  ;;  %vm1894_vm8 = vcmp.eq.f32.partialorder %v1889_v46, 0.0 }
 0x45e   : > { %v1774_v49 = vpop.f32.mrb[4].mxu0  ;;  %v1846_v54 = vadd.f32 %v1845_v47, %v1702_v50  ;;  %v1848_v38 = vadd.f32 %v1847_v44, %v1702_v50  ;;  %v2009_v10 = vpop.permute.xlu1 %2008 }
 0x45f   : > { %v1776_v13 = vpop.f32.mrb[5].mxu0  ;;  %v1775_v19 = vadd.f32 %v1774_v49, %v1702_v50 }
 0x460   : > { %v1777_v8 = vadd.f32 %v1776_v13, %v1702_v50 }
 0x462   : > { %v2013_v42 = vpop.permute.xlu1 %2012 }
 0x466   : > { %v2048_v25 = vpop.permute.xlu1 %2047 }
 0x467   : > { %v2699_v35 = vpop.eup %2698 }
 0x468   : > { %v1891_v36 = vmul.f32 %v2699_v35, %v1889_v46 }
 0x46a   : > { %v1893_v51 = vsel %vm1892_vm7, %v1889_v46, %v1891_v36  ;;  %v2050_v46 = vpop.permute.xlu0 %2049  ;;  %v2718_v36 = vld [vmem:[%s2811_s26 + $0x10] sm:$0xff] }
 0x46b   : > { %v1896_v57 = vsel %vm1894_vm8, %v1895_v12, %v1893_v51  ;;  %v2719_v51 = vld [vmem:[%s2811_s26 + $0x18] sm:$0xff] }
 0x46c   : > { %v1897_v52 = vadd.f32 1e-09, %v1896_v57 }
 0x46e   : > { %2700 = vrcp.f32 %v1897_v52 }
 0x478   : > { %v2701_v58 = vpop.eup %2700 }
 0x479   : > { %v1905_v1 = vmul.f32 %v2701_v58, %v1901_v56  ;;  %v1906_v31 = vmul.f32 %v2701_v58, %v1902_v11  ;;  %v1903_v59 = vmul.f32 %v2701_v58, %v1899_v53  ;;  %v1904_v60 = vmul.f32 %v2701_v58, %v1900_v55 }
 0x47a   : > { %v2016_v53 = vsel %vm1947_vm11, %v2009_v10, %v2011_v24  ;;  %v2024_v56 = vmul.f32 %v2718_v36, %v2009_v10 }
 0x47b   : > { %v2184_v61 = vadd.f32 -5.0, %v1905_v1  ;;  %v2185_v62 = vadd.f32 -5.0, %v1906_v31  ;;  %v2182_v0 = vadd.f32 -5.0, %v1903_v59  ;;  %v2183_v41 = vadd.f32 -5.0, %v1904_v60 }
 0x47c   : > { %v2055_v31 = vsel %vm1947_vm11, %v2048_v25, %v2050_v46 }
 0x47d   : > { %v1913_v4 = vsub.f32 0.0, %v2184_v61  ;;  %v1914_v7 = vsub.f32 0.0, %v2185_v62  ;;  %v1911_v63 = vsub.f32 0.0, %v2182_v0  ;;  %v1912_v3 = vsub.f32 0.0, %v2183_v41 }
 0x47e   : > { %v2025_v61 = vmul.f32 %v2719_v51, %v2016_v53 }
 0x47f   : > { %v1919_v2 = vmul.f32 1.442695, %v1913_v4  ;;  %v1921_v22 = vmul.f32 1.442695, %v1914_v7  ;;  %v1915_v9 = vmul.f32 1.442695, %v1911_v63 }
 0x480   : > { %v1917_v17 = vmul.f32 1.442695, %v1912_v3  ;;  %v2720_v7 = vld [vmem:[%s2811_s26 + $0x20] sm:$0xff] }
 0x481   : > { %2702 = vpow2.f32 %v1919_v2  ;;  %v2017_v2 = vsel %vm1947_vm11, %v2011_v24, %v2013_v42 }
 0x482   : > { %2704 = vpow2.f32 %v1921_v22  ;;  %v2721_v22 = vld [vmem:[%s2811_s26 + $0x28] sm:$0xff]  ;;  %v2026_v50 = vmul.f32 %v2720_v7, %v2017_v2 }
 0x483   : > { %2706 = vpow2.f32 %v1915_v9 }
 0x484   : > { %2708 = vpow2.f32 %v1917_v17 }
 0x48b   : > { %v2703_v33 = vpop.eup %2702 }
 0x48c   : > { %v2705_v16 = vpop.eup %2704  ;;  %v1925_v15 = vadd.f32 1.0, %v2703_v33  ;;  %v2018_v33 = vsel %vm1947_vm11, %v2013_v42, %v2015_v6 }
 0x48d   : > { %v2707_v26 = vpop.eup %2706  ;;  %v1926_v23 = vadd.f32 1.0, %v2705_v16  ;;  %v2722_v16 = vld [vmem:[%s2811_s26 + $0x30] sm:$0xff]  ;;  %s2188_s26 = sshll.u32 %s3361_s22, 5 }
 0x48e   : > { %v2709_v37 = vpop.eup %2708  ;;  %2710 = vrcp.f32 %v1925_v15  ;;  %v1923_v27 = vadd.f32 1.0, %v2707_v26  ;;  %s268_s18 = scalar_lea.vmem %s3351_s6, %s2188_s26 }
 0x48f   : > { %2712 = vrcp.f32 %v1926_v23  ;;  %v1924_v48 = vadd.f32 1.0, %v2709_v37 }
 0x490   : > { %2714 = vrcp.f32 %v1923_v27 }
 0x491   : > { %2716 = vrcp.f32 %v1924_v48 }
 0x498   : > { %v2711_v5 = vpop.eup %2710 }
 0x499   : > { %v2713_v28 = vpop.eup %2712  ;;  %v1963_v34 = vmul.f32 %v2711_v5, %v1846_v54  ;;  %v1933_v40 = vsub.f32 1.0, %v2711_v5 }
 0x49a   : > { %v2715_v29 = vpop.eup %2714  ;;  %v1964_v30 = vmul.f32 %v2713_v28, %v1848_v38  ;;  %v1934_v14 = vsub.f32 1.0, %v2713_v28  ;;  %v2027_v28 = vmul.f32 %v2721_v22, %v2018_v33 }
 0x49b   : > { %v2717_v20 = vpop.eup %2716  ;;  %v1961_v21 = vmul.f32 %v2715_v29, %v1775_v19  ;;  %v1931_v32 = vsub.f32 1.0, %v2715_v29 }
 0x49c   : > { %v1962_v39 = vmul.f32 %v2717_v20, %v1777_v8  ;;  %v1932_v18 = vsub.f32 1.0, %v2717_v20  ;;  %v2028_v8 = vmul.f32 %v2722_v16, %v2015_v6 }
 0x49d   : > { %1939 = vrot.lane.b32.xlu1 %v1931_v32, %s2761_s15 }
 0x49e   : > { %1941 = vrot.lane.b32.xlu0 %v1932_v18, %s2761_s15 }
 0x4a1   : > { %1943 = vrot.lane.b32.xlu1 %v1933_v40, %s2761_s15 }
 0x4a2   : > { %1945 = vrot.lane.b32.xlu0 %v1934_v14, %s2761_s15 }
 0x4a5   : > { %1969 = vrot.lane.b32.xlu1 %v1961_v21, %s2761_s15 }
 0x4a6   : > { %1971 = vrot.lane.b32.xlu0 %v1962_v39, %s2761_s15 }
 0x4a9   : > { %1973 = vrot.lane.b32.xlu1 %v1963_v34, %s2761_s15 }
 0x4aa   : > { %1975 = vrot.lane.b32.xlu0 %v1964_v30, %s2761_s15 }
 0x4ad   : > { %2051 = vrot.lane.b32.xlu1 %v3298_v45, %s2761_s15 }
 0x4ae   : > { %2053 = vrot.lane.b32.xlu0 %v3296_v43, %s2761_s15 }
 0x50f   : > { %v1940_v47 = vpop.permute.xlu1 %1939 }
 0x510   : > { %v1942_v44 = vpop.permute.xlu0 %1941  ;;  %v1956_v12 = vmul.f32 %v2718_v36, %v1940_v47 }
 0x511   : > { %v1948_v35 = vsel %vm1947_vm11, %v1940_v47, %v1942_v44 }
 0x512   : > { %v1957_v57 = vmul.f32 %v2719_v51, %v1948_v35 }
 0x513   : > { %v1944_v49 = vpop.permute.xlu1 %1943 }
 0x514   : > { %v1946_v13 = vpop.permute.xlu0 %1945  ;;  %v1949_v11 = vsel %vm1947_vm11, %v1942_v44, %v1944_v49 }
 0x515   : > { %v1950_v59 = vsel %vm1947_vm11, %v1944_v49, %v1946_v13  ;;  %v1958_v63 = vmul.f32 %v2720_v7, %v1949_v11  ;;  %v1960_v15 = vmul.f32 %v2722_v16, %v1946_v13 }
 0x516   : > { %v1959_v9 = vmul.f32 %v2721_v22, %v1950_v59 }
 0x517   : > { %v1970_v45 = vpop.permute.xlu1 %1969 }
 0x518   : > { %v1985_v43 = vadd.f32 %v1970_v45, %v1956_v12  ;;  %v1972_v52 = vpop.permute.xlu0 %1971 }
 0x519   : > { %v1977_v55 = vsel %vm1947_vm11, %v1970_v45, %v1972_v52 }
 0x51a   : > { %v2063_v58 = vmul.f32 %v2048_v25, %v1985_v43  ;;  %v1986_v1 = vadd.f32 %v1977_v55, %v1957_v57 }
 0x51b   : > { %v1974_v60 = vpop.permute.xlu1 %1973 }
 0x51c   : > { %v2068_v62 = vadd.f32 %v2063_v58, %v2024_v56  ;;  %v2064_v0 = vmul.f32 %v2055_v31, %v1986_v1  ;;  %v1976_v41 = vpop.permute.xlu0 %1975  ;;  %v1978_v4 = vsel %vm1947_vm11, %v1972_v52, %v1974_v60 }
 0x51d   : > { %v1979_v3 = vsel %vm1947_vm11, %v1974_v60, %v1976_v41  ;;  %v1987_v26 = vadd.f32 %v1978_v4, %v1958_v63  ;;  %v1989_v54 = vadd.f32 %v1976_v41, %v1960_v15 }
 0x51e   : > { %v2069_v17 = vadd.f32 %v2064_v0, %v2025_v61  ;;  %2078 = vrot.lane.b32.xlu1 %v2068_v62, %s2735_s7  ;;  %v1988_v37 = vadd.f32 %v1979_v3, %v1959_v9 }
 0x51f   : > { %v2052_v23 = vpop.permute.xlu1 %2051 }
 0x520   : > { %2080 = vrot.lane.b32.xlu0 %v2069_v17, %s2735_s7  ;;  %v2054_v27 = vpop.permute.xlu0 %2053  ;;  %v2056_v48 = vsel %vm1947_vm11, %v2050_v46, %v2052_v23 }
 0x521   : > { %v2057_v5 = vsel %vm1947_vm11, %v2052_v23, %v2054_v27  ;;  %v2065_v38 = vmul.f32 %v2056_v48, %v1987_v26  ;;  %v2067_v19 = vmul.f32 %v2054_v27, %v1989_v54 }
 0x522   : > { %v2066_v34 = vmul.f32 %v2057_v5, %v1988_v37 }
 0x523   : > { %v2070_v29 = vadd.f32 %v2065_v38, %v2026_v50  ;;  %v2072_v20 = vadd.f32 %v2067_v19, %v2028_v8 }
 0x524   : > { %v2071_v30 = vadd.f32 %v2066_v34, %v2027_v28 }
 0x525   : > { %2082 = vrot.lane.b32.xlu1 %v2070_v29, %s2735_s7 }
 0x526   : > { %2084 = vrot.lane.b32.xlu0 %v2071_v30, %s2735_s7 }
 0x529   : > { %2086 = vrot.lane.b32.xlu1 %v2072_v20, %s2735_s7 }
 0x590   : > { %v2079_v21 = vpop.permute.xlu1 %2078 }
 0x592   : > { %v2081_v32 = vpop.permute.xlu0 %2080 }
 0x593   : > { %v2088_v39 = vsel %vm386_vm4, %v2079_v21, %v2081_v32 }
 0x594   : > { %2096 = vst [vmem:[%s268_s18] sm:$0xff] %v2088_v39 }
 0x597   : > { %v2083_v18 = vpop.permute.xlu1 %2082 }
 0x598   : > { %v2085_v40 = vpop.permute.xlu0 %2084  ;;  %v2089_v14 = vsel %vm386_vm4, %v2081_v32, %v2083_v18 }
 0x599   : > { %v2090_v10 = vsel %vm386_vm4, %v2083_v18, %v2085_v40  ;;  %2097 = vst [vmem:[%s268_s18 + $0x8] sm:$0xff] %v2089_v14 }
 0x59a   : > { %2098 = vst [vmem:[%s268_s18 + $0x10] sm:$0xff] %v2090_v10 }
 0x59b   : > { %v2087_v24 = vpop.permute.xlu1 %2086 }
 0x59c   : > { %v2091_v42 = vsel %vm386_vm4, %v2085_v40, %v2087_v24 }
 0x59d   : > { %2099 = vst [vmem:[%s268_s18 + $0x18] sm:$0xff] %v2091_v42 }
 0x59e PF: > { %s16_s21 = sadd.s32 1, %s2729_s21  }
 0x59f   : > { %p13_p4 = scmp.ge.s32.totalorder %s16_s21, 4  }
 0x5a1   :  { %15 = sbr.rel (!%p13_p4) target bundleno = 1 (0x1), region = 77 }

</bundles_post_ra>
